<compile_context>
chip_gen: v7x
topology: tpu7x:2x2x1
jax: 0.10.0
libtpu: 0.0.40
codegen_flags: <defaults>
</compile_context>

<pallas_src>
import functools

import jax
import jax.numpy as jnp
from jax import lax
from jax.experimental import pallas as pl
from jax.experimental.pallas import tpu as pltpu


# --------------------------------------------------------------------------------
# small helpers
# --------------------------------------------------------------------------------
def _round_up(n, m):
    return (n + m - 1) // m * m


def _r8(n):
    return _round_up(n, 8)


def _r128(n):
    return _round_up(n, 128)


def _cdiv(a, b):
    return -(-a // b)


def _vmem_cap_bytes():
    # Trace-time hardware query; fall back to the smallest generation (v7x, 64 MiB)
    # if the query is unavailable so the sizing stays conservative.
    try:
        return int(pltpu.get_tpu_info().vmem_capacity_bytes)
    except Exception:
        return 64 * 1024 * 1024


def _vmem_limit_bytes():
    # 64 MiB on v5e/v6e (128 MiB physical), ~48 MiB on v7x (64 MiB physical).
    return min(64 * 1024 * 1024, (3 * _vmem_cap_bytes()) // 4)


# --------------------------------------------------------------------------------
# one-time weight packing (hoisted out of the per-call forward)
# --------------------------------------------------------------------------------
def prepare_lora_conv_params(params, *, kernel_size, lora_scale,
                             compute_dtype=jnp.bfloat16):
    """Pack PyTorch-layout weights into fused, lane-padded matmul operands."""
    kh = kw = int(kernel_size)
    c_out, c_in = int(params['W_w'].shape[0]), int(params['W_w'].shape[1])
    rank = int(params['A_w'].shape[0])
    c_dim = int(params['beta_w'].shape[1])
    cout_pad = _r128(c_out)
    rank_pad = _r128(rank)
    ncols = cout_pad + rank_pad

    # OIHW -> (kh*kw, C_in, C_out / rank); reduction order (i, j, c_in).
    w_t = jnp.transpose(params['W_w'], (2, 3, 1, 0)).reshape(kh * kw, c_in, c_out)
    a_t = jnp.transpose(params['A_w'], (2, 3, 1, 0)).reshape(kh * kw, c_in, rank)
    wa = jnp.zeros((kh * kw, c_in, ncols), jnp.float32)
    wa = wa.at[:, :, :c_out].set(w_t).at[:, :, cout_pad:cout_pad + rank].set(a_t)

    beta_m = params['beta_w'][:, :, 0, 0].T               # (c_dim, rank)
    gamma_m = params['gamma_w'][:, :, 0, 0].T              # (c_dim, rank)
    bg = jnp.zeros((c_dim, 2 * rank_pad), jnp.float32)
    bg = bg.at[:, :rank].set(beta_m).at[:, rank_pad:rank_pad + rank].set(gamma_m)

    # lora_scale folded into B; padded rank rows / C_out cols stay zero.
    b_m = jnp.zeros((rank_pad, cout_pad), jnp.float32)
    b_m = b_m.at[:rank, :c_out].set(lora_scale * params['B_w'][:, :, 0, 0].T)

    bias = jnp.zeros((1, cout_pad), jnp.float32).at[0, :c_out].set(params['W_b'])

    return dict(
        WA=wa.astype(compute_dtype), BG=bg.astype(compute_dtype),
        Bm=b_m.astype(compute_dtype), bias=bias,            # bias stays f32
        kh=kh, kw=kw, c_in=c_in, c_out=c_out, rank=rank, c_dim=c_dim,
        cout_pad=cout_pad, rank_pad=rank_pad, compute_dtype=compute_dtype)


# --------------------------------------------------------------------------------
# kernels
# --------------------------------------------------------------------------------
def _film_lora_epilogue(wa_acc, cc, bias_ref, bg_ref, b_ref, cout_pad, rank_pad):
    """Shared FiLM + LoRA-up epilogue on the fused f32 accumulator."""
    w_out = wa_acc[:, :cout_pad] + bias_ref[...]            # frozen conv + bias
    a_out = wa_acc[:, cout_pad:]                            # LoRA down-projection
    # FiLM projections: one matmul against [beta | gamma] (1x1 convs).
    bg = jnp.dot(cc, bg_ref[...], preferred_element_type=jnp.float32)
    shift = bg[:, :rank_pad]
    scale = bg[:, rank_pad:] + 1.0
    # bf16 x bf16 up-projection on the MXU; lora_scale already folded into b_ref.
    a_cond = (a_out * scale + shift).astype(b_ref.dtype)
    b_out = jnp.dot(a_cond, b_ref[...], preferred_element_type=jnp.float32)
    return w_out + b_out


def _lora_conv_band_kernel(xm_ref, xh_ref, c_ref, wa_ref, bias_ref, bg_ref, b_ref,
                           o_ref, *, kh, kw, tr, wo, cout_pad, rank_pad):
    """stride==1 path: in-kernel patch building from an NHWC row band + 8-row halo."""
    xm = xm_ref[0]                                   # (tr, Wp, C_in)   bf16
    xh = xh_ref[0]                                   # (8,  Wp, C_in)   bf16 halo
    ncols = cout_pad + rank_pad
    rows_per_tile = tr * wo

    acc = jnp.zeros((rows_per_tile, ncols), jnp.float32)
    for i in range(kh):                              # static unrolled kh*kw loop
        if i == 0:
            rows = xm
        elif i < tr:
            rows = jnp.concatenate([xm[i:], xh[:i]], axis=0)
        else:                                        # only when kh-1 == tr == 8
            rows = xh
        for j in range(kw):
            patch = rows[:, j:j + wo, :].reshape(rows_per_tile, rows.shape[-1])
            acc = acc + jnp.dot(patch, wa_ref[i * kw + j],
                                preferred_element_type=jnp.float32)

    cc = c_ref[0].reshape(rows_per_tile, c_ref.shape[-1])
    out = _film_lora_epilogue(acc, cc, bias_ref, bg_ref, b_ref, cout_pad, rank_pad)
    o_ref[0] = out.reshape(tr, wo, cout_pad).astype(o_ref.dtype)


def _lora_conv_patches_kernel(xp_ref, c_ref, wa_ref, bias_ref, bg_ref, b_ref, o_ref,
                              *, cout_pad, rank_pad):
    """stride!=1 fallback: pre-extracted (bf16) im2col patches, single fused matmul."""
    acc = jnp.dot(xp_ref[...], wa_ref[...], preferred_element_type=jnp.float32)
    out = _film_lora_epilogue(acc, c_ref[...], bias_ref, bg_ref, b_ref,
                              cout_pad, rank_pad)
    o_ref[...] = out.astype(o_ref.dtype)


# --------------------------------------------------------------------------------
# tile sizing
# --------------------------------------------------------------------------------
def _band_vmem_bytes(tr, kh, kw, wp, wo, c_in, c_dim, cout_pad, rank_pad, out_bytes):
    ncols = cout_pad + rank_pad
    b = 0
    b += 2 * tr * _r8(wp) * _r128(c_in) * 2              # x main block (dbl-buffered)
    b += 2 * 8 * _r8(wp) * _r128(c_in) * 2               # halo block
    b += 2 * tr * _r8(wo) * _r128(c_dim) * 2             # conditioning block
    b += 2 * tr * _r8(wo) * _r128(cout_pad) * out_bytes  # output block
    b += 2 * kh * kw * _r8(c_in) * _r128(ncols) * 2      # [W|A]   (default 2 buffers)
    b += 2 * _r8(c_dim) * _r128(2 * rank_pad) * 2        # [beta|gamma]
    b += 2 * _r8(rank_pad) * _r128(cout_pad) * 2         # lora_scale * B
    b += 2 * 8 * _r128(cout_pad) * 4                     # bias
    b += _r8(tr * wo) * _r128(ncols) * 4                 # f32 accumulator
    b += _r8(tr * wo) * _r128(cout_pad) * 4              # epilogue temporaries
    b += 2 * tr * _r8(wp) * _r128(c_in) * 2              # patch slice / concat temps
    return b


def _choose_tr(batch, ho, wo, budget, est_fn):
    # ~1024 output pixels per tile to amortize per-step overhead.
    tr = min(_round_up(ho, 8), max(8, ((1024 // max(wo, 1)) // 8) * 8))
    while tr > 8 and est_fn(tr) > budget:
        tr = max(8, ((tr // 2) // 8) * 8)
    # Keep >= 4 grid steps when possible so dual-TensorCore parts (v7x) can use
    # both cores via the "parallel" grid axes.  Free on v5e/v6e.
    while tr > 8 and batch * _cdiv(ho, tr) < 4:
        tr = max(8, ((tr // 2) // 8) * 8)
    return tr


# --------------------------------------------------------------------------------
# forward wrappers
# --------------------------------------------------------------------------------
def _forward_band(x, c, prep, *, padding, out_dtype):
    kh, kw = prep['kh'], prep['kw']
    c_in, c_out, c_dim = prep['c_in'], prep['c_out'], prep['c_dim']
    cout_pad, rank_pad = prep['cout_pad'], prep['rank_pad']
    cdt = prep['compute_dtype']
    batch, _, h, w = x.shape
    hp, wp = h + 2 * padding, w + 2 * padding
    ho, wo = hp - kh + 1, wp - kw + 1
    if c.shape != (batch, c_dim, ho, wo):
        raise ValueError(f"conditioning shape {c.shape} != {(batch, c_dim, ho, wo)}")
    out_dtype = out_dtype or x.dtype
    ncols = cout_pad + rank_pad

    vmem_limit = _vmem_limit_bytes()
    est = lambda tr: _band_vmem_bytes(tr, kh, kw, wp, wo, c_in, c_dim, cout_pad,
                                      rank_pad, jnp.dtype(out_dtype).itemsize)
    tr = _choose_tr(batch, ho, wo, (7 * vmem_limit) // 8, est)
    n_tiles = _cdiv(ho, tr)
    ho_pad = n_tiles * tr
    rx = max(hp, ho_pad + 8)                 # main rows + 8-row halo (kh-1 <= 8)
    halo_step = tr // 8

    # bf16 BEFORE padding/transpose: this is the only wrapper-side copy of x.
    x_nhwc = jnp.transpose(x.astype(cdt), (0, 2, 3, 1))
    x_nhwc = jnp.pad(x_nhwc, ((0, 0), (padding, rx - h - padding),
                              (padding, padding), (0, 0)))
    c_nhwc = jnp.transpose(c.astype(cdt), (0, 2, 3, 1))
    if ho_pad != ho:
        c_nhwc = jnp.pad(c_nhwc, ((0, 0), (0, ho_pad - ho), (0, 0), (0, 0)))

    kernel = functools.partial(_lora_conv_band_kernel, kh=kh, kw=kw, tr=tr, wo=wo,
                               cout_pad=cout_pad, rank_pad=rank_pad)

    out = pl.pallas_call(
        kernel,
        out_shape=jax.ShapeDtypeStruct((batch, ho_pad, wo, cout_pad), out_dtype),
        grid_spec=pltpu.PrefetchScalarGridSpec(
            num_scalar_prefetch=0,
            grid=(batch, n_tiles),
            in_specs=[
                pl.BlockSpec((1, tr, wp, c_in), lambda b, t: (b, t, 0, 0)),       # band
                pl.BlockSpec((1, 8, wp, c_in),
                             lambda b, t: (b, (t + 1) * halo_step, 0, 0)),        # halo
                pl.BlockSpec((1, tr, wo, c_dim), lambda b, t: (b, t, 0, 0)),      # cond
                pl.BlockSpec((kh * kw, c_in, ncols), lambda b, t: (0, 0, 0)),     # [W|A]
                pl.BlockSpec((1, cout_pad), lambda b, t: (0, 0)),                 # bias
                pl.BlockSpec((c_dim, 2 * rank_pad), lambda b, t: (0, 0)),         # [b|g]
                pl.BlockSpec((rank_pad, cout_pad), lambda b, t: (0, 0)),          # B
            ],
            out_specs=pl.BlockSpec((1, tr, wo, cout_pad), lambda b, t: (b, t, 0, 0)),
        ),
        compiler_params=pltpu.CompilerParams(
            dimension_semantics=("parallel", "parallel"),
            vmem_limit_bytes=vmem_limit,
        ),
    )(x_nhwc, x_nhwc, c_nhwc, prep['WA'], prep['bias'], prep['BG'], prep['Bm'])

    out = out[:, :ho, :, :c_out]                           # drop padded rows / lanes
    return jnp.transpose(out, (0, 3, 1, 2))                # back to NCHW


def _im2col_nchw(x_nchw, kh, kw, stride, padding):
    """(B,C,H,W) -> (B*Ho*Wo, kh*kw*C_in), reduction order (kh, kw, C_in)."""
    x = jnp.transpose(x_nchw, (0, 2, 3, 1))
    x = jnp.pad(x, ((0, 0), (padding, padding), (padding, padding), (0, 0)))
    b, hp, wp, c_in = x.shape
    ho = (hp - kh) // stride + 1
    wo = (wp - kw) // stride + 1
    cols = []
    for i in range(kh):
        for j in range(kw):
            cols.append(x[:, i:i + stride * ho:stride, j:j + stride * wo:stride, :])
    patches = jnp.stack(cols, axis=3)                      # (B, Ho, Wo, kh*kw, C_in)
    return patches.reshape(b * ho * wo, kh * kw * c_in), ho, wo


def _forward_patches(x, c, prep, *, stride, padding, out_dtype):
    kh, kw = prep['kh'], prep['kw']
    c_in, c_out, c_dim = prep['c_in'], prep['c_out'], prep['c_dim']
    cout_pad, rank_pad = prep['cout_pad'], prep['rank_pad']
    cdt = prep['compute_dtype']
    batch = x.shape[0]
    out_dtype = out_dtype or x.dtype
    ncols = cout_pad + rank_pad

    # bf16 BEFORE patch extraction: the kh*kw-amplified intermediate is half-size.
    xp, ho, wo = _im2col_nchw(x.astype(cdt), kh, kw, stride, padding)
    if c.shape != (batch, c_dim, ho, wo):
        raise ValueError(f"conditioning shape {c.shape} != {(batch, c_dim, ho, wo)}")
    m, kdim = xp.shape
    c_flat = jnp.transpose(c.astype(cdt), (0, 2, 3, 1)).reshape(m, c_dim)

    vmem_limit = _vmem_limit_bytes()
    tm = min(512, _round_up(m, 8))
    while tm > 8 and (2 * tm * kdim * 2 + 2 * kdim * ncols * 2
                      + 2 * tm * cout_pad * 4 + tm * ncols * 4) > (3 * vmem_limit) // 4:
        tm = max(8, ((tm // 2) // 8) * 8)
    while tm > 8 and _cdiv(m, tm) < 4:                     # keep both v7x cores busy
        tm = max(8, ((tm // 2) // 8) * 8)
    mp = _cdiv(m, tm) * tm
    if mp != m:
        xp = jnp.pad(xp, ((0, mp - m), (0, 0)))
        c_flat = jnp.pad(c_flat, ((0, mp - m), (0, 0)))

    kernel = functools.partial(_lora_conv_patches_kernel,
                               cout_pad=cout_pad, rank_pad=rank_pad)
    out = pl.pallas_call(
        kernel,
        out_shape=jax.ShapeDtypeStruct((mp, cout_pad), out_dtype),
        grid_spec=pltpu.PrefetchScalarGridSpec(
            num_scalar_prefetch=0,
            grid=(mp // tm,),
            in_specs=[
                pl.BlockSpec((tm, kdim), lambda i: (i, 0)),
                pl.BlockSpec((tm, c_dim), lambda i: (i, 0)),
                pl.BlockSpec((kdim, ncols), lambda i: (0, 0)),
                pl.BlockSpec((1, cout_pad), lambda i: (0, 0)),
                pl.BlockSpec((c_dim, 2 * rank_pad), lambda i: (0, 0)),
                pl.BlockSpec((rank_pad, cout_pad), lambda i: (0, 0)),
            ],
            out_specs=pl.BlockSpec((tm, cout_pad), lambda i: (i, 0)),
        ),
        compiler_params=pltpu.CompilerParams(
            dimension_semantics=("parallel",),
            vmem_limit_bytes=vmem_limit,
        ),
    )(xp, c_flat, prep['WA'].reshape(kh * kw * c_in, ncols), prep['bias'],
      prep['BG'], prep['Bm'])

    out = out[:m, :c_out].reshape(batch, ho, wo, c_out)
    return jnp.transpose(out, (0, 3, 1, 2))


def lora_adapter_conv_forward(x, c, prep, *, stride, padding, out_dtype=None):
    """Fused LoRAAdapterConv forward. x: (B,C_in,H,W), c: (B,c_dim,Ho,Wo), NCHW out."""
    if stride == 1 and prep['kh'] <= 9:
        return _forward_band(x, c, prep, padding=padding, out_dtype=out_dtype)
    return _forward_patches(x, c, prep, stride=stride, padding=padding,
                            out_dtype=out_dtype)


# --------------------------------------------------------------------------------
# pure-JAX reference (matches the PyTorch module semantics with f32 convs)
# --------------------------------------------------------------------------------
def _reference_forward(x, c, params, *, stride, padding, lora_scale):
    dn = ('NCHW', 'OIHW', 'NCHW')
    pad = [(padding, padding), (padding, padding)]
    w_out = lax.conv_general_dilated(x, params['W_w'], (stride, stride), pad,
                                     dimension_numbers=dn)
    w_out = w_out + params['W_b'][None, :, None, None]
    a_out = lax.conv_general_dilated(x, params['A_w'], (stride, stride), pad,
                                     dimension_numbers=dn)
    shift = lax.conv_general_dilated(c, params['beta_w'], (1, 1), [(0, 0), (0, 0)],
                                     dimension_numbers=dn)
    scale = lax.conv_general_dilated(c, params['gamma_w'], (1, 1), [(0, 0), (0, 0)],
                                     dimension_numbers=dn) + 1.0
    a_cond = a_out * scale + shift
    b_out = lax.conv_general_dilated(a_cond, params['B_w'], (1, 1), [(0, 0), (0, 0)],
                                     dimension_numbers=dn)
    return w_out + lora_scale * b_out


if __name__ == "__main__":
    key = jax.random.PRNGKey(0)
    B, Cin, H, W = 2, 4, 16, 16
    Cout, rank, c_dim = 8, 4, 6
    ksize, stride, padding = 3, 1, 1
    lora_scale = 0.5

    keys = jax.random.split(key, 8)
    fan_in = Cin * ksize * ksize
    params = {
        'W_w': jax.random.normal(keys[0], (Cout, Cin, ksize, ksize), jnp.float32)
               * (1.0 / jnp.sqrt(fan_in)),
        'W_b': jax.random.normal(keys[1], (Cout,), jnp.float32) * 0.1,
        # kaiming_normal_(a=1) -> std = 1/sqrt(fan_in)
        'A_w': jax.random.normal(keys[2], (rank, Cin, ksize, ksize), jnp.float32)
               * (1.0 / jnp.sqrt(fan_in)),
        # PyTorch zero-inits B; use small values so the LoRA path is exercised.
        'B_w': jax.random.normal(keys[3], (Cout, rank, 1, 1), jnp.float32) * 0.1,
        'beta_w': jax.random.normal(keys[4], (rank, c_dim, 1, 1), jnp.float32)
                  * (1.0 / jnp.sqrt(c_dim)),
        'gamma_w': jax.random.normal(keys[5], (rank, c_dim, 1, 1), jnp.float32)
                   * (1.0 / jnp.sqrt(c_dim)),
    }

    x = jax.random.normal(keys[6], (B, Cin, H, W), jnp.float32)
    # DataProvider batch: conditioning tensor whose spatial size matches a_out
    # (stride=1, padding=1 -> same H, W as the input).
    c = jax.random.normal(keys[7], (B, c_dim, H, W), jnp.float32)

    # One-time weight packing, then a jitted forward closing over the packed weights.
    prep = prepare_lora_conv_params(params, kernel_size=ksize, lora_scale=lora_scale)
    fwd = jax.jit(lambda xx, cc: lora_adapter_conv_forward(
        xx, cc, prep, stride=stride, padding=padding))

    out = jax.block_until_ready(fwd(x, c))
    assert out.shape == (B, Cout, H, W), out.shape

    # Reference on bf16-rounded operands (what the kernel streams) with f32 convs,
    # so the comparison isolates kernel correctness from the intentional bf16
    # input quantisation.  Bias stays f32 in the kernel -> not rounded.
    def _r(a):
        return a.astype(jnp.bfloat16).astype(jnp.float32)

    params_r = {k: (v if k == 'W_b' else _r(v)) for k, v in params.items()}
    ref = _reference_forward(_r(x), _r(c), params_r, stride=stride, padding=padding,
                             lora_scale=lora_scale)
    max_err = float(jnp.max(jnp.abs(out - ref)))
    assert jnp.allclose(out, ref, atol=1e-2, rtol=1e-2), max_err
    print("KERNEL_OK")
</pallas_src>

<mosaic_0001>
module attributes {stable_mosaic.version = 11 : i64} {
  func.func @_lora_conv_band_kernel(%arg0: i32, %arg1: i32, %arg2: memref<1x8x18x4xbf16, #tpu.memory_space<vmem>>, %arg3: memref<1x8x18x4xbf16, #tpu.memory_space<vmem>>, %arg4: memref<1x8x16x6xbf16, #tpu.memory_space<vmem>>, %arg5: memref<9x4x256xbf16, #tpu.memory_space<vmem>>, %arg6: memref<1x128xf32, #tpu.memory_space<vmem>>, %arg7: memref<6x256xbf16, #tpu.memory_space<vmem>>, %arg8: memref<128x128xbf16, #tpu.memory_space<vmem>>, %arg9: memref<1x8x16x128xf32, #tpu.memory_space<vmem>>) attributes {dimension_semantics = [#tpu.dimension_semantics<parallel>, #tpu.dimension_semantics<parallel>], iteration_bounds = array<i64: 2, 2>, scalar_prefetch = 0 : i64, scratch_operands = 0 : i64, tpu.core_type = #tpu.core_type<tc>, window_params = [{transform_indices = @transform_0, window_bounds = array<i64: 1, 8, 18, 4>}, {transform_indices = @transform_1, window_bounds = array<i64: 1, 8, 18, 4>}, {transform_indices = @transform_2, window_bounds = array<i64: 1, 8, 16, 6>}, {pipeline_mode = #tpu.pipeline_mode<synchronous>, transform_indices = @transform_3, window_bounds = array<i64: 9, 4, 256>}, {pipeline_mode = #tpu.pipeline_mode<synchronous>, transform_indices = @transform_4, window_bounds = array<i64: 1, 128>}, {pipeline_mode = #tpu.pipeline_mode<synchronous>, transform_indices = @transform_5, window_bounds = array<i64: 6, 256>}, {pipeline_mode = #tpu.pipeline_mode<synchronous>, transform_indices = @transform_6, window_bounds = array<i64: 128, 128>}, {transform_indices = @transform_7, window_bounds = array<i64: 1, 8, 16, 128>}]} {
    %c0 = arith.constant 0 : index
    %c0_0 = arith.constant 0 : index
    %c0_1 = arith.constant 0 : index
    %c0_2 = arith.constant 0 : index
    %0 = vector.load %arg2[%c0, %c0_0, %c0_1, %c0_2] : memref<1x8x18x4xbf16, #tpu.memory_space<vmem>>, vector<1x8x18x4xbf16>
    %1 = vector.shape_cast %0 : vector<1x8x18x4xbf16> to vector<8x18x4xbf16>
    %c0_3 = arith.constant 0 : index
    %c0_4 = arith.constant 0 : index
    %c0_5 = arith.constant 0 : index
    %c0_6 = arith.constant 0 : index
    %2 = vector.load %arg3[%c0_3, %c0_4, %c0_5, %c0_6] : memref<1x8x18x4xbf16, #tpu.memory_space<vmem>>, vector<1x8x18x4xbf16>
    %3 = vector.shape_cast %2 : vector<1x8x18x4xbf16> to vector<8x18x4xbf16>
    %cst = arith.constant 0.000000e+00 : f32
    %4 = vector.broadcast %cst : f32 to vector<128x256xf32>
    %5 = vector.extract_strided_slice %1 {offsets = [0, 0, 0], sizes = [8, 16, 4], strides = [1, 1, 1]} : vector<8x18x4xbf16> to vector<8x16x4xbf16>
    %6 = vector.shape_cast %5 : vector<8x16x4xbf16> to vector<128x4xbf16>
    %c0_7 = arith.constant 0 : index
    %c0_8 = arith.constant 0 : index
    %c0_9 = arith.constant 0 : index
    %7 = vector.load %arg5[%c0_7, %c0_8, %c0_9] : memref<9x4x256xbf16, #tpu.memory_space<vmem>>, vector<1x4x256xbf16>
    %8 = vector.shape_cast %7 : vector<1x4x256xbf16> to vector<4x256xbf16>
    %cst_10 = arith.constant dense<0.000000e+00> : vector<128x256xf32>
    %9 = tpu.matmul %6, %8, %cst_10 {dimension_numbers = #tpu.dot_dimension_numbers<[1], [0], [0], [1], [0, 0, 1, 1], [], []>} : vector<128x4xbf16>, vector<4x256xbf16>, vector<128x256xf32> -> vector<128x256xf32>
    %10 = arith.addf %4, %9 : vector<128x256xf32>
    %11 = vector.extract_strided_slice %1 {offsets = [0, 1, 0], sizes = [8, 16, 4], strides = [1, 1, 1]} : vector<8x18x4xbf16> to vector<8x16x4xbf16>
    %12 = vector.shape_cast %11 : vector<8x16x4xbf16> to vector<128x4xbf16>
    %c1 = arith.constant 1 : index
    %c0_11 = arith.constant 0 : index
    %c0_12 = arith.constant 0 : index
    %13 = vector.load %arg5[%c1, %c0_11, %c0_12] : memref<9x4x256xbf16, #tpu.memory_space<vmem>>, vector<1x4x256xbf16>
    %14 = vector.shape_cast %13 : vector<1x4x256xbf16> to vector<4x256xbf16>
    %cst_13 = arith.constant dense<0.000000e+00> : vector<128x256xf32>
    %15 = tpu.matmul %12, %14, %cst_13 {dimension_numbers = #tpu.dot_dimension_numbers<[1], [0], [0], [1], [0, 0, 1, 1], [], []>} : vector<128x4xbf16>, vector<4x256xbf16>, vector<128x256xf32> -> vector<128x256xf32>
    %16 = arith.addf %10, %15 : vector<128x256xf32>
    %17 = vector.extract_strided_slice %1 {offsets = [0, 2, 0], sizes = [8, 16, 4], strides = [1, 1, 1]} : vector<8x18x4xbf16> to vector<8x16x4xbf16>
    %18 = vector.shape_cast %17 : vector<8x16x4xbf16> to vector<128x4xbf16>
    %c2 = arith.constant 2 : index
    %c0_14 = arith.constant 0 : index
    %c0_15 = arith.constant 0 : index
    %19 = vector.load %arg5[%c2, %c0_14, %c0_15] : memref<9x4x256xbf16, #tpu.memory_space<vmem>>, vector<1x4x256xbf16>
    %20 = vector.shape_cast %19 : vector<1x4x256xbf16> to vector<4x256xbf16>
    %cst_16 = arith.constant dense<0.000000e+00> : vector<128x256xf32>
    %21 = tpu.matmul %18, %20, %cst_16 {dimension_numbers = #tpu.dot_dimension_numbers<[1], [0], [0], [1], [0, 0, 1, 1], [], []>} : vector<128x4xbf16>, vector<4x256xbf16>, vector<128x256xf32> -> vector<128x256xf32>
    %22 = arith.addf %16, %21 : vector<128x256xf32>
    %23 = vector.extract_strided_slice %1 {offsets = [1, 0, 0], sizes = [7, 18, 4], strides = [1, 1, 1]} : vector<8x18x4xbf16> to vector<7x18x4xbf16>
    %24 = vector.extract_strided_slice %3 {offsets = [0, 0, 0], sizes = [1, 18, 4], strides = [1, 1, 1]} : vector<8x18x4xbf16> to vector<1x18x4xbf16>
    %25 = tpu.concatenate %23, %24 in 0 : vector<7x18x4xbf16>, vector<1x18x4xbf16> -> vector<8x18x4xbf16>
    %26 = vector.extract_strided_slice %25 {offsets = [0, 0, 0], sizes = [8, 16, 4], strides = [1, 1, 1]} : vector<8x18x4xbf16> to vector<8x16x4xbf16>
    %27 = vector.shape_cast %26 : vector<8x16x4xbf16> to vector<128x4xbf16>
    %c3 = arith.constant 3 : index
    %c0_17 = arith.constant 0 : index
    %c0_18 = arith.constant 0 : index
    %28 = vector.load %arg5[%c3, %c0_17, %c0_18] : memref<9x4x256xbf16, #tpu.memory_space<vmem>>, vector<1x4x256xbf16>
    %29 = vector.shape_cast %28 : vector<1x4x256xbf16> to vector<4x256xbf16>
    %cst_19 = arith.constant dense<0.000000e+00> : vector<128x256xf32>
    %30 = tpu.matmul %27, %29, %cst_19 {dimension_numbers = #tpu.dot_dimension_numbers<[1], [0], [0], [1], [0, 0, 1, 1], [], []>} : vector<128x4xbf16>, vector<4x256xbf16>, vector<128x256xf32> -> vector<128x256xf32>
    %31 = arith.addf %22, %30 : vector<128x256xf32>
    %32 = vector.extract_strided_slice %25 {offsets = [0, 1, 0], sizes = [8, 16, 4], strides = [1, 1, 1]} : vector<8x18x4xbf16> to vector<8x16x4xbf16>
    %33 = vector.shape_cast %32 : vector<8x16x4xbf16> to vector<128x4xbf16>
    %c4 = arith.constant 4 : index
    %c0_20 = arith.constant 0 : index
    %c0_21 = arith.constant 0 : index
    %34 = vector.load %arg5[%c4, %c0_20, %c0_21] : memref<9x4x256xbf16, #tpu.memory_space<vmem>>, vector<1x4x256xbf16>
    %35 = vector.shape_cast %34 : vector<1x4x256xbf16> to vector<4x256xbf16>
    %cst_22 = arith.constant dense<0.000000e+00> : vector<128x256xf32>
    %36 = tpu.matmul %33, %35, %cst_22 {dimension_numbers = #tpu.dot_dimension_numbers<[1], [0], [0], [1], [0, 0, 1, 1], [], []>} : vector<128x4xbf16>, vector<4x256xbf16>, vector<128x256xf32> -> vector<128x256xf32>
    %37 = arith.addf %31, %36 : vector<128x256xf32>
    %38 = vector.extract_strided_slice %25 {offsets = [0, 2, 0], sizes = [8, 16, 4], strides = [1, 1, 1]} : vector<8x18x4xbf16> to vector<8x16x4xbf16>
    %39 = vector.shape_cast %38 : vector<8x16x4xbf16> to vector<128x4xbf16>
    %c5 = arith.constant 5 : index
    %c0_23 = arith.constant 0 : index
    %c0_24 = arith.constant 0 : index
    %40 = vector.load %arg5[%c5, %c0_23, %c0_24] : memref<9x4x256xbf16, #tpu.memory_space<vmem>>, vector<1x4x256xbf16>
    %41 = vector.shape_cast %40 : vector<1x4x256xbf16> to vector<4x256xbf16>
    %cst_25 = arith.constant dense<0.000000e+00> : vector<128x256xf32>
    %42 = tpu.matmul %39, %41, %cst_25 {dimension_numbers = #tpu.dot_dimension_numbers<[1], [0], [0], [1], [0, 0, 1, 1], [], []>} : vector<128x4xbf16>, vector<4x256xbf16>, vector<128x256xf32> -> vector<128x256xf32>
    %43 = arith.addf %37, %42 : vector<128x256xf32>
    %44 = vector.extract_strided_slice %1 {offsets = [2, 0, 0], sizes = [6, 18, 4], strides = [1, 1, 1]} : vector<8x18x4xbf16> to vector<6x18x4xbf16>
    %45 = vector.extract_strided_slice %3 {offsets = [0, 0, 0], sizes = [2, 18, 4], strides = [1, 1, 1]} : vector<8x18x4xbf16> to vector<2x18x4xbf16>
    %46 = tpu.concatenate %44, %45 in 0 : vector<6x18x4xbf16>, vector<2x18x4xbf16> -> vector<8x18x4xbf16>
    %47 = vector.extract_strided_slice %46 {offsets = [0, 0, 0], sizes = [8, 16, 4], strides = [1, 1, 1]} : vector<8x18x4xbf16> to vector<8x16x4xbf16>
    %48 = vector.shape_cast %47 : vector<8x16x4xbf16> to vector<128x4xbf16>
    %c6 = arith.constant 6 : index
    %c0_26 = arith.constant 0 : index
    %c0_27 = arith.constant 0 : index
    %49 = vector.load %arg5[%c6, %c0_26, %c0_27] : memref<9x4x256xbf16, #tpu.memory_space<vmem>>, vector<1x4x256xbf16>
    %50 = vector.shape_cast %49 : vector<1x4x256xbf16> to vector<4x256xbf16>
    %cst_28 = arith.constant dense<0.000000e+00> : vector<128x256xf32>
    %51 = tpu.matmul %48, %50, %cst_28 {dimension_numbers = #tpu.dot_dimension_numbers<[1], [0], [0], [1], [0, 0, 1, 1], [], []>} : vector<128x4xbf16>, vector<4x256xbf16>, vector<128x256xf32> -> vector<128x256xf32>
    %52 = arith.addf %43, %51 : vector<128x256xf32>
    %53 = vector.extract_strided_slice %46 {offsets = [0, 1, 0], sizes = [8, 16, 4], strides = [1, 1, 1]} : vector<8x18x4xbf16> to vector<8x16x4xbf16>
    %54 = vector.shape_cast %53 : vector<8x16x4xbf16> to vector<128x4xbf16>
    %c7 = arith.constant 7 : index
    %c0_29 = arith.constant 0 : index
    %c0_30 = arith.constant 0 : index
    %55 = vector.load %arg5[%c7, %c0_29, %c0_30] : memref<9x4x256xbf16, #tpu.memory_space<vmem>>, vector<1x4x256xbf16>
    %56 = vector.shape_cast %55 : vector<1x4x256xbf16> to vector<4x256xbf16>
    %cst_31 = arith.constant dense<0.000000e+00> : vector<128x256xf32>
    %57 = tpu.matmul %54, %56, %cst_31 {dimension_numbers = #tpu.dot_dimension_numbers<[1], [0], [0], [1], [0, 0, 1, 1], [], []>} : vector<128x4xbf16>, vector<4x256xbf16>, vector<128x256xf32> -> vector<128x256xf32>
    %58 = arith.addf %52, %57 : vector<128x256xf32>
    %59 = vector.extract_strided_slice %46 {offsets = [0, 2, 0], sizes = [8, 16, 4], strides = [1, 1, 1]} : vector<8x18x4xbf16> to vector<8x16x4xbf16>
    %60 = vector.shape_cast %59 : vector<8x16x4xbf16> to vector<128x4xbf16>
    %c8 = arith.constant 8 : index
    %c0_32 = arith.constant 0 : index
    %c0_33 = arith.constant 0 : index
    %61 = vector.load %arg5[%c8, %c0_32, %c0_33] : memref<9x4x256xbf16, #tpu.memory_space<vmem>>, vector<1x4x256xbf16>
    %62 = vector.shape_cast %61 : vector<1x4x256xbf16> to vector<4x256xbf16>
    %cst_34 = arith.constant dense<0.000000e+00> : vector<128x256xf32>
    %63 = tpu.matmul %60, %62, %cst_34 {dimension_numbers = #tpu.dot_dimension_numbers<[1], [0], [0], [1], [0, 0, 1, 1], [], []>} : vector<128x4xbf16>, vector<4x256xbf16>, vector<128x256xf32> -> vector<128x256xf32>
    %64 = arith.addf %58, %63 : vector<128x256xf32>
    %c0_35 = arith.constant 0 : index
    %c0_36 = arith.constant 0 : index
    %c0_37 = arith.constant 0 : index
    %c0_38 = arith.constant 0 : index
    %65 = vector.load %arg4[%c0_35, %c0_36, %c0_37, %c0_38] : memref<1x8x16x6xbf16, #tpu.memory_space<vmem>>, vector<1x8x16x6xbf16>
    %66 = vector.shape_cast %65 : vector<1x8x16x6xbf16> to vector<8x16x6xbf16>
    %67 = vector.shape_cast %66 : vector<8x16x6xbf16> to vector<128x6xbf16>
    %68 = vector.extract_strided_slice %64 {offsets = [0, 0], sizes = [128, 128], strides = [1, 1]} : vector<128x256xf32> to vector<128x128xf32>
    %c0_39 = arith.constant 0 : index
    %c0_40 = arith.constant 0 : index
    %69 = vector.load %arg6[%c0_39, %c0_40] : memref<1x128xf32, #tpu.memory_space<vmem>>, vector<1x128xf32>
    %70 = vector.broadcast %69 : vector<1x128xf32> to vector<128x128xf32>
    %71 = arith.addf %68, %70 : vector<128x128xf32>
    %72 = vector.extract_strided_slice %64 {offsets = [0, 128], sizes = [128, 128], strides = [1, 1]} : vector<128x256xf32> to vector<128x128xf32>
    %c0_41 = arith.constant 0 : index
    %c0_42 = arith.constant 0 : index
    %73 = vector.load %arg7[%c0_41, %c0_42] : memref<6x256xbf16, #tpu.memory_space<vmem>>, vector<6x256xbf16>
    %cst_43 = arith.constant dense<0.000000e+00> : vector<128x256xf32>
    %74 = tpu.matmul %67, %73, %cst_43 {dimension_numbers = #tpu.dot_dimension_numbers<[1], [0], [0], [1], [0, 0, 1, 1], [], []>} : vector<128x6xbf16>, vector<6x256xbf16>, vector<128x256xf32> -> vector<128x256xf32>
    %75 = vector.extract_strided_slice %74 {offsets = [0, 0], sizes = [128, 128], strides = [1, 1]} : vector<128x256xf32> to vector<128x128xf32>
    %76 = vector.extract_strided_slice %74 {offsets = [0, 128], sizes = [128, 128], strides = [1, 1]} : vector<128x256xf32> to vector<128x128xf32>
    %cst_44 = arith.constant 1.000000e+00 : f32
    %77 = vector.broadcast %cst_44 : f32 to vector<128x128xf32>
    %78 = arith.addf %76, %77 : vector<128x128xf32>
    %79 = arith.mulf %72, %78 : vector<128x128xf32>
    %80 = arith.addf %79, %75 : vector<128x128xf32>
    %81 = arith.truncf %80 : vector<128x128xf32> to vector<128x128xbf16>
    %c0_45 = arith.constant 0 : index
    %c0_46 = arith.constant 0 : index
    %82 = vector.load %arg8[%c0_45, %c0_46] : memref<128x128xbf16, #tpu.memory_space<vmem>>, vector<128x128xbf16>
    %cst_47 = arith.constant dense<0.000000e+00> : vector<128x128xf32>
    %83 = tpu.matmul %81, %82, %cst_47 {dimension_numbers = #tpu.dot_dimension_numbers<[1], [0], [0], [1], [0, 0, 1, 1], [], []>} : vector<128x128xbf16>, vector<128x128xbf16>, vector<128x128xf32> -> vector<128x128xf32>
    %84 = arith.addf %71, %83 : vector<128x128xf32>
    %85 = vector.shape_cast %84 : vector<128x128xf32> to vector<8x16x128xf32>
    %c0_48 = arith.constant 0 : index
    %c0_49 = arith.constant 0 : index
    %c0_50 = arith.constant 0 : index
    %c0_51 = arith.constant 0 : index
    %86 = vector.load %arg9[%c0_48, %c0_49, %c0_50, %c0_51] : memref<1x8x16x128xf32, #tpu.memory_space<vmem>>, vector<1x8x16x128xf32>
    %87 = vector.shape_cast %86 : vector<1x8x16x128xf32> to vector<8x16x128xf32>
    %88 = vector.shape_cast %85 : vector<8x16x128xf32> to vector<1x8x16x128xf32>
    tpu.vector_store %arg9[%c0_48, %c0_49, %c0_50, %c0_51], %88 {strides = array<i32>} : memref<1x8x16x128xf32, #tpu.memory_space<vmem>>, vector<1x8x16x128xf32>,
    return
  }
  func.func @transform_0(%arg0: i32, %arg1: i32) -> (i32, i32, i32, i32) {
    %c0_i32 = arith.constant 0 : i32
    %c0_i32_0 = arith.constant 0 : i32
    %c0_i32_1 = arith.constant 0 : i32
    return %arg0, %arg1, %c0_i32, %c0_i32_0 : i32, i32, i32, i32
  }
  func.func @transform_1(%arg0: i32, %arg1: i32) -> (i32, i32, i32, i32) {
    %c1_i32 = arith.constant 1 : i32
    %0 = arith.addi %arg1, %c1_i32 : i32
    %c1_i32_0 = arith.constant 1 : i32
    %1 = arith.muli %0, %c1_i32_0 : i32
    %c0_i32 = arith.constant 0 : i32
    %c0_i32_1 = arith.constant 0 : i32
    %c0_i32_2 = arith.constant 0 : i32
    return %arg0, %1, %c0_i32, %c0_i32_1 : i32, i32, i32, i32
  }
  func.func @transform_2(%arg0: i32, %arg1: i32) -> (i32, i32, i32, i32) {
    %c0_i32 = arith.constant 0 : i32
    %c0_i32_0 = arith.constant 0 : i32
    %c0_i32_1 = arith.constant 0 : i32
    return %arg0, %arg1, %c0_i32, %c0_i32_0 : i32, i32, i32, i32
  }
  func.func @transform_3(%arg0: i32, %arg1: i32) -> (i32, i32, i32) {
    %c0_i32 = arith.constant 0 : i32
    %c0_i32_0 = arith.constant 0 : i32
    %c0_i32_1 = arith.constant 0 : i32
    %c0_i32_2 = arith.constant 0 : i32
    return %c0_i32, %c0_i32_0, %c0_i32_1 : i32, i32, i32
  }
  func.func @transform_4(%arg0: i32, %arg1: i32) -> (i32, i32) {
    %c0_i32 = arith.constant 0 : i32
    %c0_i32_0 = arith.constant 0 : i32
    %c0_i32_1 = arith.constant 0 : i32
    return %c0_i32, %c0_i32_0 : i32, i32
  }
  func.func @transform_5(%arg0: i32, %arg1: i32) -> (i32, i32) {
    %c0_i32 = arith.constant 0 : i32
    %c0_i32_0 = arith.constant 0 : i32
    %c0_i32_1 = arith.constant 0 : i32
    return %c0_i32, %c0_i32_0 : i32, i32
  }
  func.func @transform_6(%arg0: i32, %arg1: i32) -> (i32, i32) {
    %c0_i32 = arith.constant 0 : i32
    %c0_i32_0 = arith.constant 0 : i32
    %c0_i32_1 = arith.constant 0 : i32
    return %c0_i32, %c0_i32_0 : i32, i32
  }
  func.func @transform_7(%arg0: i32, %arg1: i32) -> (i32, i32, i32, i32) {
    %c0_i32 = arith.constant 0 : i32
    %c0_i32_0 = arith.constant 0 : i32
    %c0_i32_1 = arith.constant 0 : i32
    return %arg0, %arg1, %c0_i32, %c0_i32_0 : i32, i32, i32, i32
  }
}

</mosaic_0001>

<bundles_post_ra>
// kernel: _lambda_.1
= control target key start
LH: loop header
LB: loop body
LE: loop exit
PB: predicated region body
PF: predicated region fallthrough
CT: control target
= control target key end

     0   :  { %s3626_s24 = smov 0   ;;  %s3628_s25 = smov 0   ;;  %s4604_s0 = inlined_call_operand.vmem [shape: bf16[2,24,18,4], index: 0, kind: input, shape index: {}, may-alias: {0,1}]   ;;  %s4605_s1 = inlined_call_operand.vmem [shape: bf16[2,24,18,4], index: 1, kind: input, shape index: {}, may-alias: {0,1}]   ;;  %s4606_s2 = inlined_call_operand.vmem [shape: bf16[2,16,16,6], index: 2, kind: input, shape index: {}]   ;;  %s4607_s3 = inlined_call_operand.vmem [shape: bf16[9,4,256], index: 3, kind: input, shape index: {}]   ;;  %s4608_s4 = inlined_call_operand.vmem [shape: f32[1,128], index: 4, kind: input, shape index: {}]   ;;  %s4609_s5 = inlined_call_operand.vmem [shape: bf16[6,256], index: 5, kind: input, shape index: {}]   ;;  %s4610_s6 = inlined_call_operand.vmem [shape: bf16[128,128], index: 6, kind: input, shape index: {}]   ;;  %s4611_s7 = inlined_call_operand.vmem [shape: f32[2,16,16,128], index: 7, kind: output, shape index: {}]  }
   0x1   :  { %s3630_s26 = smov 0   ;;  %s3632_s27 = smov 0  }
   0x2   :  { %s3634_s28 = smov 0  }
   0x3 LB: > { %s26_s29 = sadd.s32 1, %s3575_s26  ;;  %s29_s30 = sadd.s32 1, %s3579_s27  ;;  %s3583_s28 = sphi %s3634_s28, %s17_s28   ;;  %s3579_s27 = sphi %s3632_s27, %s4620_s27   ;;  %s3575_s26 = sphi %s3630_s26, %s4619_s26   ;;  %s3571_s25 = sphi %s3628_s25, %s4618_s25   ;;  %s3567_s24 = sphi %s3626_s24, %s4617_s24  }
   0x4   : > { %p27_p0 = scmp.ge.s32.totalorder %s26_s29, 2  ;;  %p2984_p1 = scmp.ge.s32.totalorder %s3583_s28, 1 }
   0x5   : > { %p299_p2 = scmp.lt.s32.totalorder %s3583_s28, 5 }
   0x6   : > { %s4622_s29 = smov (%p27_p0, %s26_s29), 0  ;;  %s4624_s30 = smov (!%p27_p0, %s29_s30), %s3579_s27 }
   0x7   : > { %p300_p3 = pnand %p2984_p1, %p299_p2  ;;  %p31_p4 = scmp.ge.s32.totalorder %s4624_s30, 2 }
   0x8   : > { %vm695_vm0 = vcmask (!%p300_p3), 1041408   ;;  %v3063_v0 = vld.sshfl [vmem:[%s4607_s3 + $0xc] sm:$0x33 pattern:$0x76325410] (!%p300_p3)  ;;  %v3585_v3 = vmov (!%p300_p3), 0  }
   0x9   : > { %s4626_s30 = smov (%p31_p4, %s4624_s30), 0  ;;  %303 = sbr.rel (%p300_p3) target bundleno = 797 (0x31d), region = 48 }
   0xa   : > { %v3661_v1 = vcombine.high (!%p300_p3), %v3063_v0, %v3063_v0  ;;  %v3664_v2 = vsel (!%p300_p3), %vm695_vm0, %v3063_v0, 0  ;;  %1341 = vmatprep.mubr.bf16.mxu0 (!%p300_p3), %v3585_v3  ;;  %v3075_v4 = vld.sshfl [vmem:[%s4607_s3 + $0x10] sm:$0x33 pattern:$0x76325410] (!%p300_p3)  ;;  %s3670_s12 = sshll.u32 (!%p300_p3), %s3567_s24, 3  ;;  %734 = vmatprep.mubr.bf16.mxu1 (!%p300_p3), %v3585_v3 }
   0xb   : > { %v1491_v5 = vcombine.high (!%p300_p3), %v3075_v4, %v3075_v4  ;;  %p363_p5 = scmp.lt.s32.totalorder (!%p300_p3), %s3571_s25, 1  ;;  %p365_p6 = scmp.lt.s32.totalorder (!%p300_p3), %s3670_s12, 23  ;;  %v3006_v6 = vld.sshfl [vmem:[%s4607_s3 + $0x4] sm:$0x33 pattern:$0x76325410] (!%p300_p3) }
   0xc   : > { %3064 = vmatprep.subr.msk.bf16.mxu0 (!%p300_p3), %vm695_vm0, %v3661_v1  ;;  %v669_v7 = vcombine.high (!%p300_p3), %v3006_v6, %v3006_v6  ;;  %v697_v8 = vsel (!%p300_p3), %vm695_vm0, %v3006_v6, 0  ;;  %v3024_v9 = vld.sshfl [vmem:[%s4607_s3] sm:$0x33 pattern:$0x76325410] (!%p300_p3)  ;;  %vm670_vm1 = vcmask (!%p300_p3), 31744  }
   0xd   : > { %1310 = vmatpush1.bf16.msra.mxu0 (!%p300_p3), %v3664_v2  ;;  %v863_v10 = vcombine.high (!%p300_p3), %v3024_v9, %v3024_v9  ;;  %v3698_v11 = vld.sshfl [vmem:[%s4607_s3 + $0x14] sm:$0x33 pattern:$0x76325410] (!%p300_p3)  ;;  %vm440_vm2 = vsmask.f32 (!%p300_p3), 3328 }
   0xe   : > { %3076 = vmatprep.subr.msk.bf16.mxu0 (!%p300_p3), %vm695_vm0, %v1491_v5  ;;  %3007 = vmatprep.subr.msk.bf16.mxu1 (!%p300_p3), %vm695_vm0, %v669_v7  ;;  %vm441_vm3 = vsmask.f32 (!%p300_p3), 7440  ;;  %v1496_v19 = vsel (!%p300_p3), %vm695_vm0, %v3075_v4, 0  ;;  %v1667_v22 = vcombine.high (!%p300_p3), %v3698_v11, %v3698_v11  ;;  %v3729_v23 = vsel (!%p300_p3), %vm695_vm0, %v3024_v9, 0  ;;  %s3166_s13 = sadd.s32 (!%p300_p3), 8, %s3670_s12  ;;  %p389_p8 = scmp.lt.s32.totalorder (!%p300_p3), %s3670_s12, 15 }
   0xf   : > { %703 = vmatpush1.bf16.msra.mxu1 (!%p300_p3), %v697_v8  ;;  %v3734_v24 = vld.sshfl [vmem:[%s4607_s3 + $0x8] sm:$0x33 pattern:$0x76325410] (!%p300_p3)  ;;  %vm3778_vm4 = vmor (!%p300_p3), %vm440_vm2, %vm441_vm3  ;;  %p3823_p7 = scmp.lt.s32.totalorder (!%p300_p3), %s3166_s13, 23  ;;  %vm1015_vm5 = vcmask (!%p300_p3), 1042432  }
  0x10   : > { %s4628_s25 = smov (!%p363_p5, %s3571_s25), 1  ;;  %3025 = vmatprep.subr.msk.bf16.mxu1 %vm695_vm0, %v863_v10  ;;  %v1108_v47 = vcombine.high %v3734_v24, %v3734_v24  ;;  %vm1016_vm6 = vcmask 1046532   ;;  %vm2445_vm8 = vcmask 48128  }
  0x11   : > { %s366_s15 = scalar_select %p365_p6, %s3670_s12, 23  ;;  %vm3953_vm7 = vmor %vm1015_vm5, %vm1016_vm6 }
  0x12   : > { %s3474_s18 = smul.u32 72, %s4628_s25  ;;  %s4630_s13 = smov (!%p3823_p7, %s3166_s13), 23 }
  0x13   : > { %s3473_s19 = smul.u32 3, %s366_s15  ;;  %s2991_s10 = sshll.u32 %s4628_s25, 5 }
  0x14   : > { %s3475_s17 = smul.u32 3, %s4630_s13  ;;  %s4632_s12 = smov (!%p389_p8, %s3670_s12), 15 }
  0x15   : > { %s369_s20 = sadd.s32 %s3474_s18, %s3473_s19  ;;  %s2990_s14 = sshll.u32 %s4632_s12, 1 }
  0x16   : > { %s2986_s23 = sshll.u32 %s369_s20, 2  ;;  %s381_s19 = sadd.s32 %s3475_s17, %s3474_s18 }
  0x17   : > { %s3703_s9 = scalar_lea.vmem %s4604_s0, %s2986_s23  ;;  %s2988_s18 = sshll.u32 %s381_s19, 2 }
  0x18   : > { %v3706_v12 = vld [vmem:[%s3703_s9 + $0xc] sm:$0xf]  ;;  %v3709_v13 = vld [vmem:[%s3703_s9 + $0x10] sm:$0xf]  ;;  %v3721_v20 = vld [vmem:[%s3703_s9 + $0x18] sm:$0xf]  ;;  %s3935_s22 = scalar_lea.vmem %s4605_s1, %s2988_s18  ;;  %s4230_s15 = sadd.s32 %s2991_s10, %s2990_s14 }
  0x19   : > { %v468_v14 = vshrl.u32 %v3706_v12, 16  ;;  %v471_v15 = vshll.u32 %v3706_v12, 16  ;;  %v477_v16 = vshll.u32 %v3709_v13, 16  ;;  %v481_v17 = vshrl.u32 %v3709_v13, 16  ;;  %v3724_v21 = vld [vmem:[%s3703_s9] sm:$0xf] }
  0x1a   : > { %v3717_v18 = vcombine.low %v3706_v12, %v3709_v13  ;;  %v3739_v29 = vld [vmem:[%s3703_s9 + $0x4] sm:$0xf]  ;;  %v3744_v30 = vld [vmem:[%s3703_s9 + $0x1c] sm:$0xf]  ;;  %v492_v31 = vshrl.u32 %v3721_v20, 16  ;;  %v495_v32 = vshll.u32 %v3721_v20, 16 }
  0x1b   : > { %v470_v25 = vrot.slane %v468_v14, 4  ;;  %v473_v26 = vrot.slane %v471_v15, 5  ;;  %v3736_v27 = vrot.slane %v477_v16, 5  ;;  %v483_v28 = vrot.slane %v481_v17, 4  ;;  %v3749_v33 = vld [vmem:[%s3703_s9 + $0x8] sm:$0x1] }
  0x1c   : > { %3065 = vmatmul.mubr.msk.bf16.vlgmr.msra.gmra.mrb[0].mxu0 %vm670_vm1, %v3717_v18  ;;  %v444_v36 = vshrl.u32 %v3724_v21, 16  ;;  %v447_v37 = vshll.u32 %v3724_v21, 16  ;;  %v505_v38 = vshrl.u32 %v3744_v30, 16  ;;  %v453_v39 = vshll.u32 %v3739_v29, 16  ;;  %v3761_v42 = vld [vmem:[%s3703_s9 + $0x14] sm:$0x1] }
  0x1d   : > { %v474_v34 = vor.u32 %v473_v26, %v470_v25  ;;  %v484_v35 = vor.u32 %v483_v28, %v3736_v27  ;;  %1502 = vmatpush1.bf16.msra.mxu0 %v1496_v19  ;;  %1351 = vmatprep.mubr.bf16.mxu0 %v3585_v3  ;;  %v457_v40 = vshrl.u32 %v3739_v29, 16  ;;  %v463_v41 = vshll.u32 %v3749_v33, 16  ;;  %v3768_v46 = vld [vmem:[%s3703_s9 + $0x20] sm:$0x1]  ;;  %v3773_v52 = vld [vmem:[%s3703_s9 + $0x24] sm:$0xf] }
  0x1e   : > { %3089 = vmatprep.subr.msk.bf16.mxu0 %vm695_vm0, %v1667_v22  ;;  %v3765_v43 = vcombine.low %v3721_v20, %v3744_v30  ;;  %v446_v44 = vrot.slane %v444_v36, 4  ;;  %v449_v45 = vrot.slane %v447_v37, 5  ;;  %v455_v50 = vrot.slane %v453_v39, 5  ;;  %v3790_v8 = vld [vmem:[%s3703_s9 + $0x28] sm:$0xf]  ;;  %s2992_s16 = sshll.u32 %s4230_s15, 2 }
  0x1f   : > { %v475_v48 = vrot.slane %v474_v34, 4  ;;  %v485_v49 = vrot.slane %v484_v35, 4  ;;  %v459_v51 = vrot.slane %v457_v40, 4  ;;  %v465_v54 = vrot.slane %v463_v41, 5  ;;  %v3803_v16 = vld [vmem:[%s3703_s9 + $0x2c] sm:$0x1]  ;;  %s4243_s12 = scalar_lea.vmem %s4606_s2, %s2992_s16 }
  0x20   : > { %v450_v53 = vor.u32 %v449_v45, %v446_v44  ;;  %v487_v55 = vshll.u32 %v3761_v42, 16  ;;  %v494_v56 = vrot.slane %v492_v31, 4  ;;  %v497_v59 = vrot.slane %v495_v32, 5  ;;  %v3806_v19 = vld [vmem:[%s3703_s9 + $0x30] sm:$0xf]  ;;  %v3532_v57 = vld [vmem:[%s4243_s12 + $0x18] sm:$0xff]  }
  0x21   : > { %v460_v58 = vor.u32 %v459_v51, %v455_v50  ;;  %v501_v60 = vshll.u32 %v3744_v30, 16  ;;  %v507_v61 = vrot.slane %v505_v38, 4  ;;  %v511_v0 = vshll.u32 %v3768_v46, 16  ;;  %v3819_v36 = vld [vmem:[%s3703_s9 + $0x34] sm:$0xf] }
  0x22   : > { %v451_v62 = vrot.slane %v450_v53, 4  ;;  %v489_v63 = vrot.slane %v487_v55, 5  ;;  %v516_v4 = vshrl.u32 %v3773_v52, 16  ;;  %v498_v6 = vor.u32 %v497_v59, %v494_v56 }
  0x23   : > { %v461_v5 = vrot.slane %v460_v58, 4  ;;  %v3787_v7 = vrot.slane %v501_v60, 5  ;;  %v519_v9 = vshll.u32 %v3773_v52, 16  ;;  %v480_v14 = vsel %vm3778_vm4, %v475_v48, %v3736_v27  ;;  %v3850_v58 = vld [vmem:[%s3703_s9 + $0x38] sm:$0x1] }
  0x24   : > { %3066 = vmatmul.mubr.msk.bf16.gmra.mrb[4].mxu0 %vm670_vm1, %v3765_v43  ;;  %v456_v10 = vsel %vm3778_vm4, %v451_v62, %v455_v50  ;;  %v490_v15 = vsel %vm3778_vm4, %v485_v49, %v489_v63  ;;  %v518_v17 = vrot.slane %v516_v4, 4  ;;  %v499_v25 = vrot.slane %v498_v6, 4  ;;  %v3814_v31 = vld.sshfl [vmem:[%s4607_s3 + $0x18] sm:$0x33 pattern:$0x76325410] }
  0x25   : > { %1533 = vmatprep.mubr.bf16.mxu0 %v3585_v3  ;;  %v466_v22 = vsel %vm3778_vm4, %v461_v5, %v465_v54  ;;  %v508_v26 = vor.u32 %v507_v61, %v3787_v7  ;;  %v513_v28 = vrot.slane %v511_v0, 5  ;;  %v521_v32 = vrot.slane %v519_v9, 5  ;;  %v3834_v49 = vld [vmem:[%s3703_s9 + $0x3c] sm:$0xf]  ;;  %v3869_v62 = vld [vmem:[%s3703_s9 + $0x48] sm:$0xf] }
  0x26   : > { %v2998_v27 = vcombine.low %v456_v10, %v466_v22  ;;  %v525_v34 = vshll.u32 %v3790_v8, 16  ;;  %v529_v35 = vshrl.u32 %v3790_v8, 16  ;;  %v2999_v37 = vcombine.low %v480_v14, %v490_v15  ;;  %v3873_v5 = vld [vmem:[%s3703_s9 + $0x44] sm:$0x1]  ;;  %v3877_v6 = vld [vmem:[%s3703_s9 + $0x4c] sm:$0xf] }
  0x27   : > { %v509_v38 = vrot.slane %v508_v26, 4  ;;  %v535_v39 = vshll.u32 %v3803_v16, 16  ;;  %v540_v40 = vshrl.u32 %v3806_v19, 16  ;;  %v522_v41 = vor.u32 %v521_v32, %v518_v17 }
  0x28   : > { %3008 = vmatmul.mubr.msk.bf16.vlgmr.msra.gmra.mrb[0].mxu1 %vm670_vm1, %v2998_v27  ;;  %v3830_v44 = vrot.slane %v525_v34, 5  ;;  %v531_v45 = vrot.slane %v529_v35, 4  ;;  %v543_v48 = vshll.u32 %v3806_v19, 16  ;;  %v1672_v50 = vsel %vm695_vm0, %v3698_v11, 0  ;;  %v3853_v11 = vld [vmem:[%s3703_s9 + $0x40] sm:$0xf] }
  0x29   : > { %744 = vmatprep.mubr.bf16.mxu1 %v3585_v3  ;;  %895 = vmatpush1.bf16.msra.mxu1 %v3729_v23  ;;  %v549_v51 = vshll.u32 %v3819_v36, 16  ;;  %v1837_v53 = vcombine.high %v3814_v31, %v3814_v31  ;;  %v504_v54 = vsel %vm3778_vm4, %v499_v25, %v3787_v7  ;;  %v514_v55 = vsel %vm3778_vm4, %v509_v38, %v513_v28 }
  0x2a   : > { %v532_v56 = vor.u32 %v531_v45, %v3830_v44  ;;  %3052 = vmatprep.subr.msk.bf16.mxu1 %vm695_vm0, %v1108_v47  ;;  %v523_v23 = vrot.slane %v522_v41, 4  ;;  %v537_v59 = vrot.slane %v535_v39, 5  ;;  %v553_v60 = vshrl.u32 %v3819_v36, 16 }
  0x2b   : > { %v564_v61 = vshrl.u32 %v3834_v49, 16  ;;  %v542_v0 = vrot.slane %v540_v40, 4  ;;  %v545_v4 = vrot.slane %v543_v48, 5  ;;  %v567_v47 = vshll.u32 %v3834_v49, 16 }
  0x2c   : > { %3077 = vmatmul.mubr.msk.bf16.vlgmr.msra.gmra.mrb[0].mxu0 %vm670_vm1, %v2999_v37  ;;  %v533_v63 = vrot.slane %v532_v56, 4  ;;  %v3879_v7 = vrot.slane %v549_v51, 5  ;;  %v555_v9 = vrot.slane %v553_v60, 4  ;;  %v573_v10 = vshll.u32 %v3853_v11, 16  ;;  %v3919_v60 = vld [vmem:[%s3703_s9 + $0x58] sm:$0xf] }
  0x2d   : > { %1678 = vmatpush1.bf16.msra.mxu0 %v1672_v50  ;;  %1543 = vmatprep.mubr.bf16.mxu0 %v3585_v3  ;;  %v566_v14 = vrot.slane %v564_v61, 4  ;;  %v569_v15 = vrot.slane %v567_v47, 5  ;;  %v577_v17 = vshrl.u32 %v3853_v11, 16  ;;  %v3885_v22 = vcombine.low %v504_v54, %v514_v55  ;;  %v3909_v50 = vld [vmem:[%s3703_s9 + $0x50] sm:$0x1] }
  0x2e   : > { %3101 = vmatprep.subr.msk.bf16.mxu0 %vm695_vm0, %v1837_v53  ;;  %v528_v25 = vsel %vm3778_vm4, %v523_v23, %v3830_v44  ;;  %v559_v26 = vshll.u32 %v3850_v58, 16  ;;  %v3891_v28 = vrot.slane %v573_v10, 5  ;;  %v538_v27 = vsel %vm3778_vm4, %v533_v63, %v537_v59  ;;  %v3914_v54 = vld [vmem:[%s3703_s9 + $0x54] sm:$0xf] }
  0x2f   : > { %v546_v32 = vor.u32 %v545_v4, %v542_v0  ;;  %v579_v34 = vrot.slane %v577_v17, 4  ;;  %v588_v35 = vshrl.u32 %v3869_v62, 16  ;;  %v556_v38 = vor.u32 %v555_v9, %v3879_v7 }
  0x30   : > { %3009 = vmatmul.mubr.msk.bf16.gmra.mrb[4].mxu1 %vm670_vm1, %v2999_v37  ;;  %v583_v39 = vshll.u32 %v3873_v5, 16  ;;  %v591_v40 = vshll.u32 %v3869_v62, 16  ;;  %v597_v41 = vshll.u32 %v3877_v6, 16  ;;  %v570_v37 = vor.u32 %v569_v15, %v566_v14 }
  0x31   : > { %754 = vmatprep.mubr.bf16.mxu1 %v3585_v3  ;;  %v580_v44 = vor.u32 %v579_v34, %v3891_v28  ;;  %v590_v45 = vrot.slane %v588_v35, 4  ;;  %v601_v48 = vshrl.u32 %v3877_v6, 16  ;;  %v1027_v55 = vrot.slane %v3709_v13, 5  ;;  %v3944_v35 = vld [vmem:[%s3703_s9 + $0x5c] sm:$0x1] }
  0x32   : > { %v593_v51 = vrot.slane %v591_v40, 5  ;;  %v3911_v53 = vrot.slane %v597_v41, 5  ;;  %v547_v56 = vrot.slane %v546_v32, 4  ;;  %v561_v23 = vrot.slane %v559_v26, 5 }
  0x33   : > { %v603_v59 = vrot.slane %v601_v48, 4  ;;  %v3921_v61 = vcombine.low %v528_v25, %v538_v27  ;;  %v557_v63 = vrot.slane %v556_v38, 4  ;;  %v585_v0 = vrot.slane %v583_v39, 5  ;;  %v3964_v48 = vld [vmem:[%s3935_s22] sm:$0xf] }
  0x34   : > { %3078 = vmatmul.mubr.msk.bf16.gmra.mrb[4].mxu0 %vm670_vm1, %v3885_v22  ;;  %v594_v4 = vor.u32 %v593_v51, %v590_v45  ;;  %v571_v47 = vrot.slane %v570_v37, 4  ;;  %v581_v9 = vrot.slane %v580_v44, 4  ;;  %v612_v10 = vshrl.u32 %v3914_v54, 16 }
  0x35   : > { %1553 = vmatprep.mubr.bf16.mxu0 %v3585_v3  ;;  %v615_v13 = vshll.u32 %v3914_v54, 16  ;;  %v604_v14 = vor.u32 %v603_v59, %v3911_v53  ;;  %v607_v15 = vshll.u32 %v3909_v50, 16  ;;  %v621_v17 = vshll.u32 %v3919_v60, 16 }
  0x36   : > { %v625_v25 = vshrl.u32 %v3919_v60, 16  ;;  %v3035_v26 = vrot.slane %v3706_v12, 9  ;;  %v1029_v27 = vrot.slane %v1027_v55, 4  ;;  %v552_v32 = vsel %vm3778_vm4, %v547_v56, %v3879_v7 }
  0x37   : > { %v562_v34 = vsel %vm3778_vm4, %v557_v63, %v561_v23  ;;  %v595_v12 = vrot.slane %v594_v4, 4  ;;  %v576_v38 = vsel %vm3778_vm4, %v571_v47, %v3891_v28  ;;  %v586_v39 = vsel %vm3778_vm4, %v581_v9, %v585_v0 }
  0x38   : > { %3010 = vmatmul.mubr.msk.bf16.gmra.mrb[8].mxu1 %vm670_vm1, %v3885_v22  ;;  %v614_v40 = vrot.slane %v612_v10, 4  ;;  %v617_v41 = vrot.slane %v615_v13, 5  ;;  %v605_v7 = vrot.slane %v604_v14, 4  ;;  %v609_v44 = vrot.slane %v607_v15, 5  ;;  %v3982_v10 = vld [vmem:[%s3935_s22 + $0x4] sm:$0xf] }
  0x39   : > { %764 = vmatprep.mubr.bf16.mxu1 %v3585_v3  ;;  %v3959_v45 = vrot.slane %v621_v17, 5  ;;  %v3961_v28 = vrot.slane %v625_v25, 4  ;;  %v1020_v51 = vrot.slane %v3739_v29, 5  ;;  %v1023_v56 = vrot.slane %v3749_v33, 5 }
  0x3a   : > { %v3969_v23 = vcombine.low %v552_v32, %v562_v34  ;;  %v631_v59 = vshll.u32 %v3944_v35, 16  ;;  %v3972_v63 = vcombine.low %v576_v38, %v586_v39  ;;  %v600_v0 = vsel %vm3778_vm4, %v595_v12, %v3911_v53 }
  0x3b   : > { %v3016_v4 = vcombine.low %v3724_v21, %v3739_v29  ;;  %v1028_v47 = vsel %vm3953_vm7, %v3035_v26, %v1027_v55  ;;  %v618_v9 = vor.u32 %v617_v41, %v614_v40  ;;  %v1455_v13 = vshrl.u32 %v3964_v48, 16 }
  0x3c   : > { %3079 = vmatmul.mubr.msk.bf16.gmra.mrb[8].mxu0 %vm670_vm1, %v3921_v61  ;;  %v1458_v14 = vshll.u32 %v3964_v48, 16  ;;  %v1030_v15 = vrot.slane %v3761_v42, 5  ;;  %v610_v17 = vsel %vm3778_vm4, %v605_v7, %v609_v44  ;;  %v628_v53 = vor.u32 %v3961_v28, %v3959_v45 }
  0x3d   : > { %1563 = vmatprep.mubr.bf16.mxu0 %v3585_v3  ;;  %v3036_v25 = vrot.slane %v3721_v20, 9  ;;  %v1034_v32 = vrot.slane %v3744_v30, 5  ;;  %v3995_v55 = vrot.slane %v631_v59, 5  ;;  %v1037_v42 = vrot.slane %v3768_v46, 5 }
  0x3e   : > { %v1031_v26 = vsel %vm3953_vm7, %v1029_v27, %v1030_v15  ;;  %v3037_v34 = vrot.slane %v3773_v52, 9  ;;  %v1464_v12 = vshll.u32 %v3982_v10, 16  ;;  %v4007_v39 = vcombine.low %v600_v0, %v610_v17 }
  0x3f   : > { %v4003_v38 = vcombine.low %v1028_v47, %v1031_v26  ;;  %v1035_v20 = vsel %vm3953_vm7, %v3036_v25, %v1034_v32  ;;  %v1036_v30 = vrot.slane %v1034_v32, 4  ;;  %v1041_v40 = vrot.slane %v3790_v8, 5 }
  0x40   : > { %3011 = vmatmul.mubr.msk.bf16.gmra.mrb[12].mxu1 %vm670_vm1, %v3921_v61  ;;  %v1044_v27 = vrot.slane %v3803_v16, 5  ;;  %v4013_v46 = vcombine.low %v3773_v52, %v3790_v8  ;;  %v3038_v7 = vrot.slane %v3806_v19, 9  ;;  %v1048_v44 = vrot.slane %v3819_v36, 5 }
  0x41   : > { %774 = vmatprep.mubr.bf16.mxu1 %v3585_v3  ;;  %v1038_v41 = vsel %vm3953_vm7, %v1036_v30, %v1037_v42  ;;  %v1051_v59 = vrot.slane %v3850_v58, 5  ;;  %v4023_v0 = vrot.slane %v618_v9, 4  ;;  %v1042_v52 = vsel %vm3953_vm7, %v3037_v34, %v1041_v40 }
  0x42   : > { %v4025_v16 = vcombine.low %v1035_v20, %v1038_v41  ;;  %v1043_v8 = vrot.slane %v1041_v40, 4  ;;  %v1468_v47 = vshrl.u32 %v3982_v10, 16  ;;  %v1049_v15 = vsel %vm3953_vm7, %v3038_v7, %v1048_v44 }
  0x43   : > { %v1050_v17 = vrot.slane %v1048_v44, 4  ;;  %v4034_v25 = vcombine.low %v3806_v19, %v3819_v36  ;;  %v3039_v9 = vrot.slane %v3834_v49, 9  ;;  %v1055_v32 = vrot.slane %v3853_v11, 5 }
  0x44   : > { %3080 = vmatmul.mubr.msk.bf16.gmra.mrb[12].mxu0 %vm670_vm1, %v3969_v23  ;;  %v1045_v58 = vsel %vm3953_vm7, %v1043_v8, %v1044_v27  ;;  %v1058_v26 = vrot.slane %v3873_v5, 5  ;;  %v4047_v20 = vcombine.low %v3834_v49, %v3853_v11  ;;  %v3040_v19 = vrot.slane %v3869_v62, 9 }
  0x45   : > { %1573 = vmatprep.mubr.bf16.mxu0 %v3585_v3  ;;  %v4041_v42 = vcombine.low %v1042_v52, %v1045_v58  ;;  %v1052_v34 = vsel %vm3953_vm7, %v1050_v17, %v1051_v59  ;;  %v1056_v5 = vsel %vm3953_vm7, %v3039_v9, %v1055_v32  ;;  %v1057_v30 = vrot.slane %v1055_v32, 4 }
  0x46   : > { %v4052_v36 = vcombine.low %v1049_v15, %v1052_v34  ;;  %v1062_v40 = vrot.slane %v3877_v6, 5  ;;  %v1065_v27 = vrot.slane %v3909_v50, 5  ;;  %v4061_v49 = vcombine.low %v3869_v62, %v3877_v6  ;;  %v435_v50 = vld [vmem:[%s3935_s22 + $0x8] sm:$0x1] }
  0x47   : > { %v3041_v11 = vrot.slane %v3914_v54, 9  ;;  %v1069_v41 = vrot.slane %v3919_v60, 5  ;;  %v1059_v7 = vsel %vm3953_vm7, %v1057_v30, %v1058_v26  ;;  %v1072_v52 = vrot.slane %v3944_v35, 5 }
  0x48   : > { %3012 = vmatmul.mubr.msk.bf16.gmra.mrb[16].mxu1 %vm670_vm1, %v3969_v23  ;;  %v1063_v44 = vsel %vm3953_vm7, %v3040_v19, %v1062_v40  ;;  %v1064_v59 = vrot.slane %v1062_v40, 4  ;;  %v4073_v8 = vcombine.low %v1056_v5, %v1059_v7  ;;  %v4079_v15 = vcombine.low %v3914_v54, %v3919_v60 }
  0x49   : > { %784 = vmatprep.mubr.bf16.mxu1 %v3585_v3  ;;  %v1070_v62 = vsel %vm3953_vm7, %v3041_v11, %v1069_v41  ;;  %v1071_v6 = vrot.slane %v1069_v41, 4  ;;  %v3085_v35 = vrot.slane %v3964_v48, 9  ;;  %v1649_v58 = vrot.slane %v3982_v10, 5 }
  0x4a   : > { %v1066_v17 = vsel %vm3953_vm7, %v1064_v59, %v1065_v27  ;;  %v1652_v9 = vrot.slane %v435_v50, 5  ;;  %v3034_v34 = vrot.slane %v3724_v21, 9  ;;  %v1022_v54 = vrot.slane %v1020_v51, 4 }
  0x4b   : > { %v4086_v32 = vcombine.low %v1063_v44, %v1066_v17  ;;  %v1073_v26 = vsel %vm3953_vm7, %v1071_v6, %v1072_v52  ;;  %v1457_v60 = vrot.slane %v1455_v13, 4  ;;  %v1650_v5 = vsel %vm3953_vm7, %v3085_v35, %v1649_v58 }
  0x4c   : > { %3081 = vmatmul.mubr.msk.bf16.gmra.mrb[16].mxu0 %vm670_vm1, %v3972_v63  ;;  %v4095_v19 = vcombine.low %v1070_v62, %v1073_v26  ;;  %v1651_v30 = vrot.slane %v1649_v58, 4  ;;  %v629_v40 = vrot.slane %v628_v53, 4  ;;  %v1460_v27 = vrot.slane %v1458_v14, 5  ;;  %v3529_v26 = vld [vmem:[%s4243_s12] sm:$0xff]  }
  0x4d   : > { %1583 = vmatprep.mubr.bf16.mxu0 %v3585_v3  ;;  %v4108_v11 = vsel %vm3953_vm7, %v3034_v34, %v1020_v51  ;;  %v4114_v13 = vsel %vm3953_vm7, %v1022_v54, %v1023_v56  ;;  %v1466_v28 = vrot.slane %v1464_v12, 5  ;;  %v1470_v53 = vrot.slane %v1468_v47, 4 }
  0x4e   : > { %v1653_v14 = vsel %vm3953_vm7, %v1651_v30, %v1652_v9  ;;  %v3043_v51 = vcombine.low %v4108_v11, %v4114_v13  ;;  %v1474_v56 = vshll.u32 %v435_v50, 16  ;;  %v624_v12 = vsel %vm3778_vm4, %v4023_v0, %v3959_v45  ;;  %v3531_v11 = vld [vmem:[%s4243_s12 + $0x10] sm:$0xff]   ;;  %v3533_v13 = vld [vmem:[%s4243_s12 + $0x20] sm:$0xff]  }
  0x4f   : > { %v4125_v33 = vcombine.low %v1650_v5, %v1653_v14  ;;  %v634_v47 = vsel %vm3778_vm4, %v629_v40, %v3995_v55  ;;  %v1461_v41 = vor.u32 %v1460_v27, %v1457_v60  ;;  %v1471_v7 = vor.u32 %v1470_v53, %v1466_v28  ;;  %v3530_v40 = vld [vmem:[%s4243_s12 + $0x8] sm:$0xff]  }
  0x50   : > { %3013 = vmatmul.mubr.msk.bf16.gmra.mrb[20].mxu1 %vm670_vm1, %v3972_v63  ;;  %v4137_v44 = vcombine.low %v624_v12, %v634_v47  ;;  %v1476_v50 = vrot.slane %v1474_v56, 5  ;;  %v4144_v62 = vcombine.low %v3964_v48, %v3982_v10  ;;  %v1134_v48 = vsel %vm695_vm0, %v3734_v24, 0  ;;  %v3112_v10 = vld.sshfl [vmem:[%s4607_s3 + $0x1c] sm:$0x33 pattern:$0x76325410] }
  0x51   : > { %794 = vmatprep.mubr.bf16.mxu1 %v3585_v3  ;;  %v1462_v59 = vrot.slane %v1461_v41, 4  ;;  %v1472_v52 = vrot.slane %v1471_v7, 4  ;;  %v1842_v6 = vsel %vm695_vm0, %v3814_v31, 0  ;;  %v2029_v17 = vcombine.high %v3112_v10, %v3112_v10  ;;  %v3537_v56 = vld [vmem:[%s4610_s6] sm:$0xff]   ;;  %v3538_v12 = vld [vmem:[%s4610_s6 + $0x8] sm:$0xff]   ;;  %v3540_v7 = vld [vmem:[%s4610_s6 + $0x18] sm:$0xff]  }
  0x52   : > { %v2034_v24 = vsel %vm695_vm0, %v3112_v10, 0 }
  0x53   : > { %v1467_v45 = vsel %vm3778_vm4, %v1462_v59, %v1466_v28  ;;  %v1477_v55 = vsel %vm3778_vm4, %v1472_v52, %v1476_v50  ;;  %v3541_v52 = vld [vmem:[%s4610_s6 + $0x20] sm:$0xff]  }
  0x54   : > { %3082 = vmatmul.mubr.msk.bf16.gmra.mrb[20].mxu0 %vm670_vm1, %v4007_v39  ;;  %v4153_v0 = vcombine.low %v1467_v45, %v1477_v55  ;;  %v3542_v45 = vld [vmem:[%s4610_s6 + $0x28] sm:$0xff]   ;;  %v3543_v55 = vld [vmem:[%s4610_s6 + $0x30] sm:$0xff]  }
  0x55   : > { %1593 = vmatprep.mubr.bf16.mxu0 %v3585_v3 }
  0x58   : > { %3014 = vmatmul.mubr.msk.bf16.gmra.mrb[24].mxu1 %vm670_vm1, %v4007_v39 }
  0x59   : > { %804 = vmatprep.mubr.bf16.mxu1 %v3585_v3 }
  0x5c   : > { %3083 = vmatmul.mubr.msk.bf16.gmra.mrb[24].mxu0 %vm670_vm1, %v4137_v44 }
  0x5d   : > { %1603 = vmatprep.mubr.bf16.mxu0 %v3585_v3 }
  0x60   : > { %3015 = vmatmul.mubr.msk.bf16.gmra.mrb[28].mxu1 %vm670_vm1, %v4137_v44 }
  0x61   : > { %926 = vmatprep.mubr.bf16.mxu1 %v3585_v3 }
  0x64   : > { %3084 = vmatmul.mubr.msk.bf16.gmra.mrb[28].mxu0 %vm670_vm1, %v4153_v0 }
  0x65   : > { %1709 = vmatprep.mubr.bf16.mxu0 %v3585_v3 }
  0x68   : > { %3026 = vmatmul.mubr.msk.bf16.vlgmr.msra.gmra.mrb[0].mxu1 %vm670_vm1, %v3016_v4 }
  0x69   : > { %936 = vmatprep.mubr.bf16.mxu1 %v3585_v3  ;;  %1140 = vmatpush1.bf16.msra.mxu1 %v1134_v48 }
  0x6a   : > { %3215 = vmatprep.subr.msk.bf16.mxu1 %vm695_vm0, %v3661_v1  ;;  %v2399_v1 = vld [vmem:[%s4609_s5] sm:$0x77] }
  0x6b   : > { %v3145_v21 = vcombine.high %v2399_v1, %v2399_v1  ;;  %v3144_v4 = vcombine.low %v2399_v1, %v2399_v1 }
  0x6c   : > { %3090 = vmatmul.mubr.msk.bf16.vlgmr.msra.gmra.mrb[0].mxu0 %vm670_vm1, %v4003_v38 }
  0x6d   : > { %1848 = vmatpush1.bf16.msra.mxu0 %v1842_v6  ;;  %1719 = vmatprep.mubr.bf16.mxu0 %v3585_v3 }
  0x6e   : > { %3113 = vmatprep.subr.msk.bf16.mxu0 %vm695_vm0, %v2029_v17 }
  0x70   : > { %3027 = vmatmul.mubr.msk.bf16.gmra.mrb[4].mxu1 %vm670_vm1, %v3717_v18  ;;  %v3125_v18 = vld.sshfl [vmem:[%s4607_s3 + $0x20] sm:$0x33 pattern:$0x76325410] }
  0x71   : > { %946 = vmatprep.mubr.bf16.mxu1 %v3585_v3  ;;  %v2205_v29 = vcombine.high %v3125_v18, %v3125_v18  ;;  %v2210_v35 = vsel %vm695_vm0, %v3125_v18, 0 }
  0x74   : > { %3091 = vmatmul.mubr.msk.bf16.gmra.mrb[4].mxu0 %vm670_vm1, %v4025_v16 }
  0x75   : > { %1729 = vmatprep.mubr.bf16.mxu0 %v3585_v3 }
  0x78   : > { %3028 = vmatmul.mubr.msk.bf16.gmra.mrb[8].mxu1 %vm670_vm1, %v3765_v43 }
  0x79   : > { %956 = vmatprep.mubr.bf16.mxu1 %v3585_v3 }
  0x7c   : > { %3092 = vmatmul.mubr.msk.bf16.gmra.mrb[8].mxu0 %vm670_vm1, %v4041_v42 }
  0x7d   : > { %1739 = vmatprep.mubr.bf16.mxu0 %v3585_v3 }
  0x80   : > { %3029 = vmatmul.mubr.msk.bf16.gmra.mrb[12].mxu1 %vm670_vm1, %v4013_v46 }
  0x81   : > { %966 = vmatprep.mubr.bf16.mxu1 %v3585_v3 }
  0x84   : > { %3093 = vmatmul.mubr.msk.bf16.gmra.mrb[12].mxu0 %vm670_vm1, %v4052_v36 }
  0x85   : > { %1749 = vmatprep.mubr.bf16.mxu0 %v3585_v3 }
  0x88   : > { %3030 = vmatmul.mubr.msk.bf16.gmra.mrb[16].mxu1 %vm670_vm1, %v4034_v25 }
  0x89   : > { %976 = vmatprep.mubr.bf16.mxu1 %v3585_v3 }
  0x8c   : > { %3094 = vmatmul.mubr.msk.bf16.gmra.mrb[16].mxu0 %vm670_vm1, %v4073_v8 }
  0x8d   : > { %1759 = vmatprep.mubr.bf16.mxu0 %v3585_v3 }
  0x90   : > { %3031 = vmatmul.mubr.msk.bf16.gmra.mrb[20].mxu1 %vm670_vm1, %v4047_v20 }
  0x91   : > { %986 = vmatprep.mubr.bf16.mxu1 %v3585_v3 }
  0x94   : > { %3095 = vmatmul.mubr.msk.bf16.gmra.mrb[20].mxu0 %vm670_vm1, %v4086_v32 }
  0x95   : > { %1769 = vmatprep.mubr.bf16.mxu0 %v3585_v3 }
  0x98   : > { %3032 = vmatmul.mubr.msk.bf16.gmra.mrb[24].mxu1 %vm670_vm1, %v4061_v49 }
  0x99   : > { %996 = vmatprep.mubr.bf16.mxu1 %v3585_v3 }
  0x9c   : > { %3096 = vmatmul.mubr.msk.bf16.gmra.mrb[24].mxu0 %vm670_vm1, %v4095_v19 }
  0x9d   : > { %1779 = vmatprep.mubr.bf16.mxu0 %v3585_v3 }
  0xa0   : > { %3033 = vmatmul.mubr.msk.bf16.gmra.mrb[28].mxu1 %vm670_vm1, %v4079_v15 }
  0xa1   : > { %1171 = vmatprep.mubr.bf16.mxu1 %v3585_v3 }
  0xa4   : > { %3097 = vmatmul.mubr.msk.bf16.gmra.mrb[28].mxu0 %vm670_vm1, %v4125_v33 }
  0xa5   : > { %1879 = vmatprep.mubr.bf16.mxu0 %v3585_v3 }
  0xa8   : > { %3053 = vmatmul.mubr.msk.bf16.vlgmr.msra.gmra.mrb[0].mxu1 %vm670_vm1, %v3043_v51 }
  0xa9   : > { %1181 = vmatprep.mubr.bf16.mxu1 %v3585_v3  ;;  %3216 = vmatpush1.bf16.msra.mxu1 %v3664_v2  ;;  %v4287_v2 = vld [vmem:[%s3935_s22 + $0xc] sm:$0xf] }
  0xaa   : > { %3146 = vmatprep.subr.msk.bf16.mxu1 %vm1015_vm5, %v3145_v21  ;;  %v3122_v28 = vrot.slane %v4287_v2, 9 }
  0xac   : > { %3102 = vmatmul.mubr.msk.bf16.vlgmr.msra.gmra.mrb[0].mxu0 %vm670_vm1, %v3765_v43  ;;  %v4290_v43 = vld [vmem:[%s3935_s22 + $0x10] sm:$0xf] }
  0xad   : > { %2040 = vmatpush1.bf16.msra.mxu0 %v2034_v24  ;;  %1889 = vmatprep.mubr.bf16.mxu0 %v3585_v3  ;;  %v3099_v31 = vcombine.low %v4287_v2, %v4290_v43 }
  0xae   : > { %3126 = vmatprep.subr.msk.bf16.mxu0 %vm695_vm0, %v2205_v29 }
  0xb0   : > { %3054 = vmatmul.mubr.msk.bf16.gmra.mrb[4].mxu1 %vm670_vm1, %v4003_v38  ;;  %v2472_v38 = vsel %vm1015_vm5, %v3144_v4, 0 }
  0xb1   : > { %1191 = vmatprep.mubr.bf16.mxu1 %v3585_v3 }
  0xb4   : > { %3103 = vmatmul.mubr.msk.bf16.gmra.mrb[4].mxu0 %vm670_vm1, %v4013_v46 }
  0xb5   : > { %1899 = vmatprep.mubr.bf16.mxu0 %v3585_v3 }
  0xb8   : > { %3055 = vmatmul.mubr.msk.bf16.gmra.mrb[8].mxu1 %vm670_vm1, %v4025_v16 }
  0xb9   : > { %1201 = vmatprep.mubr.bf16.mxu1 %v3585_v3 }
  0xbc   : > { %3104 = vmatmul.mubr.msk.bf16.gmra.mrb[8].mxu0 %vm670_vm1, %v4034_v25 }
  0xbd   : > { %1909 = vmatprep.mubr.bf16.mxu0 %v3585_v3 }
  0xc0   : > { %3056 = vmatmul.mubr.msk.bf16.gmra.mrb[12].mxu1 %vm670_vm1, %v4041_v42 }
  0xc1   : > { %1211 = vmatprep.mubr.bf16.mxu1 %v3585_v3 }
  0xc4   : > { %3105 = vmatmul.mubr.msk.bf16.gmra.mrb[12].mxu0 %vm670_vm1, %v4047_v20 }
  0xc5   : > { %1919 = vmatprep.mubr.bf16.mxu0 %v3585_v3 }
  0xc8   : > { %3057 = vmatmul.mubr.msk.bf16.gmra.mrb[16].mxu1 %vm670_vm1, %v4052_v36 }
  0xc9   : > { %1221 = vmatprep.mubr.bf16.mxu1 %v3585_v3 }
  0xcc   : > { %3106 = vmatmul.mubr.msk.bf16.gmra.mrb[16].mxu0 %vm670_vm1, %v4061_v49 }
  0xcd   : > { %1929 = vmatprep.mubr.bf16.mxu0 %v3585_v3 }
  0xd0   : > { %3058 = vmatmul.mubr.msk.bf16.gmra.mrb[20].mxu1 %vm670_vm1, %v4073_v8 }
  0xd1   : > { %1231 = vmatprep.mubr.bf16.mxu1 %v3585_v3 }
  0xd4   : > { %3107 = vmatmul.mubr.msk.bf16.gmra.mrb[20].mxu0 %vm670_vm1, %v4079_v15 }
  0xd5   : > { %1939 = vmatprep.mubr.bf16.mxu0 %v3585_v3 }
  0xd8   : > { %3059 = vmatmul.mubr.msk.bf16.gmra.mrb[24].mxu1 %vm670_vm1, %v4086_v32 }
  0xd9   : > { %1241 = vmatprep.mubr.bf16.mxu1 %v3585_v3 }
  0xdc   : > { %3108 = vmatmul.mubr.msk.bf16.gmra.mrb[24].mxu0 %vm670_vm1, %v4144_v62 }
  0xdd   : > { %1949 = vmatprep.mubr.bf16.mxu0 %v3585_v3 }
  0xe0   : > { %3060 = vmatmul.mubr.msk.bf16.gmra.mrb[28].mxu1 %vm670_vm1, %v4095_v19 }
  0xe1   : > { %1361 = vmatprep.mubr.bf16.mxu1 %v3585_v3 }
  0xe4   : > { %3109 = vmatmul.mubr.msk.bf16.gmra.mrb[28].mxu0 %vm670_vm1, %v3099_v31 }
  0xe5   : > { %2071 = vmatprep.mubr.bf16.mxu0 %v3585_v3 }
  0xe8   : > { %3067 = vmatmul.mubr.msk.bf16.vlgmr.msra.gmra.mrb[8].mxu1 %vm670_vm1, %v4013_v46 }
  0xe9   : > { %1371 = vmatprep.mubr.bf16.mxu1 %v3585_v3  ;;  %2478 = vmatpush1.bf16.msra.mxu1 %v2472_v38 }
  0xea   : > { %3183 = vmatprep.subr.bf16.mxu1 %v3537_v56 }
  0xec   : > { %3114 = vmatmul.mubr.msk.bf16.vlgmr.msra.gmra.mrb[0].mxu0 %vm670_vm1, %v3885_v22  ;;  %v1993_v22 = vshrl.u32 %v4287_v2, 16 }
  0xed   : > { %2216 = vmatpush1.bf16.msra.mxu0 %v2210_v35  ;;  %2081 = vmatprep.mubr.bf16.mxu0 %v3585_v3 }
  0xee   : > { %v1995_v46 = vrot.slane %v1993_v22, 4 }
  0xf0   : > { %3068 = vmatmul.mubr.msk.bf16.gmra.mrb[12].mxu1 %vm670_vm1, %v4034_v25 }
  0xf1   : > { %1381 = vmatprep.mubr.bf16.mxu1 %v3585_v3 }
  0xf4   : > { %3115 = vmatmul.mubr.msk.bf16.gmra.mrb[4].mxu0 %vm670_vm1, %v3921_v61  ;;  %v1996_v61 = vshll.u32 %v4287_v2, 16 }
  0xf5   : > { %2091 = vmatprep.mubr.bf16.mxu0 %v3585_v3 }
  0xf6   : > { %v1998_v25 = vrot.slane %v1996_v61, 5 }
  0xf8   : > { %3069 = vmatmul.mubr.msk.bf16.gmra.mrb[16].mxu1 %vm670_vm1, %v4047_v20 }
  0xf9   : > { %1391 = vmatprep.mubr.bf16.mxu1 %v3585_v3 }
  0xfc   : > { %3116 = vmatmul.mubr.msk.bf16.gmra.mrb[8].mxu0 %vm670_vm1, %v3969_v23  ;;  %v2006_v23 = vshrl.u32 %v4290_v43, 16 }
  0xfd   : > { %2101 = vmatprep.mubr.bf16.mxu0 %v3585_v3 }
 0x100   : > { %3070 = vmatmul.mubr.msk.bf16.gmra.mrb[20].mxu1 %vm670_vm1, %v4061_v49  ;;  %v2008_v49 = vrot.slane %v2006_v23, 4 }
 0x101   : > { %1401 = vmatprep.mubr.bf16.mxu1 %v3585_v3 }
 0x104   : > { %3117 = vmatmul.mubr.msk.bf16.gmra.mrb[12].mxu0 %vm670_vm1, %v3972_v63  ;;  %v2002_v63 = vshll.u32 %v4290_v43, 16 }
 0x105   : > { %2111 = vmatprep.mubr.bf16.mxu0 %v3585_v3 }
 0x106   : > { %v2004_v20 = vrot.slane %v2002_v63, 5 }
 0x108   : > { %3071 = vmatmul.mubr.msk.bf16.gmra.mrb[24].mxu1 %vm670_vm1, %v4079_v15  ;;  %v438_v15 = vld [vmem:[%s3935_s22 + $0x14] sm:$0x1]  ;;  %v2009_v58 = vor.u32 %v2008_v49, %v2004_v20 }
 0x109   : > { %1411 = vmatprep.mubr.bf16.mxu1 %v3585_v3  ;;  %v2012_v9 = vshll.u32 %v438_v15, 16  ;;  %v2190_v14 = vrot.slane %v438_v15, 5 }
 0x10a   : > { %v2010_v54 = vrot.slane %v2009_v58, 4 }
 0x10b   : > { %v2014_v60 = vrot.slane %v2012_v9, 5 }
 0x10c   : > { %3118 = vmatmul.mubr.msk.bf16.gmra.mrb[16].mxu0 %vm670_vm1, %v4007_v39  ;;  %v1999_v39 = vor.u32 %v1998_v25, %v1995_v46 }
 0x10d   : > { %2121 = vmatprep.mubr.bf16.mxu0 %v3585_v3  ;;  %v2015_v30 = vsel %vm3778_vm4, %v2010_v54, %v2014_v60 }
 0x10e   : > { %v2000_v34 = vrot.slane %v1999_v39, 4 }
 0x110   : > { %3072 = vmatmul.mubr.msk.bf16.gmra.mrb[28].mxu1 %vm670_vm1, %v4144_v62  ;;  %v2005_v5 = vsel %vm3778_vm4, %v2000_v34, %v2004_v20 }
 0x111   : > { %2509 = vmatprep.mubr.bf16.mxu1 %v3585_v3  ;;  %v3111_v27 = vcombine.low %v2005_v5, %v2015_v30 }
 0x114   : > { %3119 = vmatmul.mubr.msk.bf16.gmra.mrb[20].mxu0 %vm670_vm1, %v4137_v44 }
 0x115   : > { %2131 = vmatprep.mubr.bf16.mxu0 %v3585_v3 }
 0x118   : > { %3147 = vmatmul.mubr.msk.bf16.vlgmr.msra.gmra.mrb[32].mxu1 %vm2445_vm8, %v3529_v26 }
 0x119   : > { %2519 = vmatprep.mubr.bf16.mxu1 %v3585_v3  ;;  %3184 = vmatpush3.bf16.msra.mxu1 %v3537_v56 }
 0x11a   : > { %3185 = vmatprep.subr.bf16.mxu1 %v3538_v12 }
 0x11c   : > { %3120 = vmatmul.mubr.msk.bf16.gmra.mrb[24].mxu0 %vm670_vm1, %v4153_v0  ;;  %v3544_v0 = vld [vmem:[%s4610_s6 + $0x38] sm:$0xff]  }
 0x11d   : > { %2141 = vmatprep.mubr.bf16.mxu0 %v3585_v3  ;;  %3186 = vmatpush3.bf16.msra.mxu1 %v3538_v12 }
 0x120   : > { %3148 = vmatmul.mubr.msk.bf16.gmra.mrb[36].mxu1 %vm2445_vm8, %v3530_v40 }
 0x121   : > { %2529 = vmatprep.mubr.bf16.mxu1 %v3585_v3 }
 0x124   : > { %3121 = vmatmul.mubr.msk.bf16.gmra.mrb[28].mxu0 %vm670_vm1, %v3111_v27 }
 0x125   : > { %2247 = vmatprep.mubr.bf16.mxu0 %v3585_v3 }
 0x128   : > { %3149 = vmatmul.mubr.msk.bf16.gmra.mrb[40].mxu1 %vm2445_vm8, %v3531_v11 }
 0x129   : > { %2539 = vmatprep.mubr.bf16.mxu1 %v3585_v3 }
 0x12c   : > { %3127 = vmatmul.mubr.msk.bf16.vlgmr.msra.gmra.mrb[0].mxu0 %vm670_vm1, %v4025_v16  ;;  %v3534_v16 = vld [vmem:[%s4243_s12 + $0x28] sm:$0xff]  }
 0x12d   : > { %2257 = vmatprep.mubr.bf16.mxu0 %v3585_v3 }
 0x130   : > { %3150 = vmatmul.mubr.msk.bf16.gmra.mrb[44].mxu1 %vm2445_vm8, %v3532_v57 }
 0x131   : > { %2549 = vmatprep.mubr.bf16.mxu1 %v3585_v3 }
 0x134   : > { %3128 = vmatmul.mubr.msk.bf16.gmra.mrb[4].mxu0 %vm670_vm1, %v4041_v42  ;;  %v3535_v42 = vld [vmem:[%s4243_s12 + $0x30] sm:$0xff]  }
 0x135   : > { %2267 = vmatprep.mubr.bf16.mxu0 %v3585_v3 }
 0x138   : > { %3151 = vmatmul.mubr.msk.bf16.gmra.mrb[48].mxu1 %vm2445_vm8, %v3533_v13 }
 0x139   : > { %2559 = vmatprep.mubr.bf16.mxu1 %v3585_v3 }
 0x13c   : > { %3129 = vmatmul.mubr.msk.bf16.gmra.mrb[8].mxu0 %vm670_vm1, %v4052_v36  ;;  %v3536_v36 = vld [vmem:[%s4243_s12 + $0x38] sm:$0xff]   ;;  %s2996_s12 = sshll.u32 %s4230_s15, 3 }
 0x13d   : > { %2277 = vmatprep.mubr.bf16.mxu0 %v3585_v3  ;;  %s4556_s22 = scalar_lea.vmem %s4611_s7, %s2996_s12 }
 0x140   : > { %3152 = vmatmul.mubr.msk.bf16.gmra.mrb[52].mxu1 %vm2445_vm8, %v3534_v16 }
 0x141   : > { %2569 = vmatprep.mubr.bf16.mxu1 %v3585_v3 }
 0x144   : > { %3130 = vmatmul.mubr.msk.bf16.gmra.mrb[12].mxu0 %vm670_vm1, %v4073_v8  ;;  %v2187_v8 = vrot.slane %v4290_v43, 5 }
 0x145   : > { %2287 = vmatprep.mubr.bf16.mxu0 %v3585_v3 }
 0x146   : > { %v2189_v53 = vrot.slane %v2187_v8, 4 }
 0x148   : > { %3153 = vmatmul.mubr.msk.bf16.gmra.mrb[56].mxu1 %vm2445_vm8, %v3535_v42  ;;  %v2191_v51 = vsel %vm3953_vm7, %v2189_v53, %v2190_v14 }
 0x149   : > { %2579 = vmatprep.mubr.bf16.mxu1 %v3585_v3 }
 0x14c   : > { %3131 = vmatmul.mubr.msk.bf16.gmra.mrb[16].mxu0 %vm670_vm1, %v4086_v32  ;;  %v2188_v32 = vsel %vm3953_vm7, %v3122_v28, %v2187_v8 }
 0x14d   : > { %2297 = vmatprep.mubr.bf16.mxu0 %v3585_v3 }
 0x150   : > { %3154 = vmatmul.mubr.msk.bf16.gmra.mrb[60].mxu1 %vm2445_vm8, %v3536_v36 }
 0x154   : > { %3132 = vmatmul.mubr.msk.bf16.gmra.mrb[20].mxu0 %vm670_vm1, %v4095_v19  ;;  %v3124_v19 = vcombine.low %v2188_v32, %v2191_v51 }
 0x155   : > { %2307 = vmatprep.mubr.bf16.mxu0 %v3585_v3 }
 0x15c   : > { %3133 = vmatmul.mubr.msk.bf16.gmra.mrb[24].mxu0 %vm670_vm1, %v4125_v33 }
 0x15d   : > { %2317 = vmatprep.mubr.bf16.mxu0 %v3585_v3  ;;  %v3539_v3 = vld [vmem:[%s4610_s6 + $0x10] sm:$0xff]  }
 0x15e   : > { %3187 = vmatprep.subr.bf16.mxu1 %v3539_v3 }
 0x15f   : > { %3188 = vmatpush3.bf16.msra.mxu1 %v3539_v3 }
 0x160   : > { %3189 = vmatprep.subr.bf16.mxu1 %v3540_v7 }
 0x163   : > { %3190 = vmatpush3.bf16.msra.mxu1 %v3540_v7 }
 0x164   : > { %3134 = vmatmul.mubr.msk.bf16.gmra.mrb[28].mxu0 %vm670_vm1, %v3124_v19  ;;  %3191 = vmatprep.subr.bf16.mxu1 %v3541_v52 }
 0x167   : > { %3192 = vmatpush3.bf16.msra.mxu1 %v3541_v52 }
 0x168   : > { %3193 = vmatprep.subr.bf16.mxu1 %v3542_v45 }
 0x16b   : > { %3194 = vmatpush3.bf16.msra.mxu1 %v3542_v45 }
 0x16c   : > { %3195 = vmatprep.subr.bf16.mxu1 %v3543_v55 }
 0x16f   : > { %3196 = vmatpush3.bf16.msra.mxu1 %v3543_v55 }
 0x170   : > { %3197 = vmatprep.subr.bf16.mxu1 %v3544_v0 }
 0x173   : > { %3198 = vmatpush3.bf16.msra.mxu1 %v3544_v0 }
 0x17b   : > { %v1173_v37 = vpop.f32.mrb[0].mxu1 }
 0x17c   : > { %v1175_v33 = vpop.f32.mrb[1].mxu1 }
 0x17d   : > { %v4411_v47 = vpop.f32.mrb[2].mxu1 }
 0x17e   : > { %v4413_v41 = vpop.f32.mrb[3].mxu1 }
 0x183   : > { %v4418_v44 = vpop.f32.mrb[4].mxu1 }
 0x184   : > { %v4420_v59 = vpop.f32.mrb[5].mxu1 }
 0x185   : > { %v4425_v50 = vpop.f32.mrb[6].mxu1 }
 0x186   : > { %v4427_v62 = vpop.f32.mrb[7].mxu1 }
 0x1bb   : > { %v4438_v48 = vpop.f32.mrb[8].mxu1 }
 0x1bc   : > { %v4440_v10 = vpop.f32.mrb[9].mxu1 }
 0x1bd   : > { %v4442_v6 = vpop.f32.mrb[10].mxu1 }
 0x1be   : > { %v4444_v17 = vpop.f32.mrb[11].mxu1 }
 0x1c3   : > { %v4446_v1 = vpop.f32.mrb[12].mxu1 }
 0x1c4   : > { %v4448_v18 = vpop.f32.mrb[13].mxu1 }
 0x1c5   : > { %v4450_v21 = vpop.f32.mrb[14].mxu1 }
 0x1c6   : > { %v4452_v24 = vpop.f32.mrb[15].mxu1 }
 0x1cb   : > { %v4454_v29 = vpop.f32.mrb[16].mxu1 }
 0x1cc   : > { %v4456_v2 = vpop.f32.mrb[17].mxu1 }
 0x1cd   : > { %v4458_v43 = vpop.f32.mrb[18].mxu1 }
 0x1ce   : > { %v4460_v31 = vpop.f32.mrb[19].mxu1 }
 0x1d3   : > { %v4462_v4 = vpop.f32.mrb[20].mxu1 }
 0x1d4   : > { %v4464_v38 = vpop.f32.mrb[21].mxu1 }
 0x1d5   : > { %v4466_v35 = vpop.f32.mrb[22].mxu1 }
 0x1d6   : > { %v4468_v22 = vpop.f32.mrb[23].mxu1 }
 0x1db   : > { %v4470_v61 = vpop.f32.mrb[24].mxu1 }
 0x1dc   : > { %v4472_v23 = vpop.f32.mrb[25].mxu1 }
 0x1dd   : > { %v4474_v63 = vpop.f32.mrb[26].mxu1 }
 0x1de   : > { %v4476_v46 = vpop.f32.mrb[27].mxu1 }
 0x1e3   : > { %v4478_v25 = vpop.f32.mrb[28].mxu1 }
 0x1e4   : > { %v4480_v20 = vpop.f32.mrb[29].mxu1 }
 0x1e5   : > { %v4482_v49 = vpop.f32.mrb[30].mxu1 }
 0x1e6   : > { %v4484_v15 = vpop.f32.mrb[31].mxu1 }
 0x1eb   : > { %v2511_v39 = vpop.f32.mrb[32].mxu1 }
 0x1ec   : > { %v2513_v58 = vpop.f32.mrb[33].mxu1 }
 0x1ed   : > { %v2515_v9 = vpop.f32.mrb[34].mxu1  ;;  %v2590_v11 = vadd.f32 1.0, %v2513_v58 }
 0x1ee   : > { %v2517_v26 = vpop.f32.mrb[35].mxu1 }
 0x1ef   : > { %v2591_v14 = vadd.f32 1.0, %v2517_v26 }
 0x1f3   : > { %v2521_v34 = vpop.f32.mrb[36].mxu1 }
 0x1f4   : > { %v2523_v54 = vpop.f32.mrb[37].mxu1 }
 0x1f5   : > { %v2525_v60 = vpop.f32.mrb[38].mxu1  ;;  %v2592_v45 = vadd.f32 1.0, %v2523_v54 }
 0x1f6   : > { %v2527_v5 = vpop.f32.mrb[39].mxu1 }
 0x1fb   : > { %v2531_v30 = vpop.f32.mrb[40].mxu1 }
 0x1fc   : > { %v2533_v40 = vpop.f32.mrb[41].mxu1 }
 0x1fd   : > { %v2535_v27 = vpop.f32.mrb[42].mxu1 }
 0x1fe   : > { %v2537_v13 = vpop.f32.mrb[43].mxu1 }
 0x1ff   : > { %v2249_v57 = vpop.f32.mrb[0].mxu0 }
 0x200   : > { %v4486_v16 = vadd.f32 %v2249_v57, %v1173_v37  ;;  %v2251_v42 = vpop.f32.mrb[1].mxu0 }
 0x201   : > { %v3218_v36 = vadd.f32 %v2251_v42, %v1175_v33  ;;  %v2253_v8 = vpop.f32.mrb[2].mxu0 }
 0x202   : > { %v4489_v28 = vadd.f32 %v2253_v8, %v4411_v47  ;;  %v2255_v53 = vpop.f32.mrb[3].mxu0 }
 0x203   : > { %v2606_v32 = vmul.f32 %v3218_v36, %v2590_v11  ;;  %v3220_v51 = vadd.f32 %v2255_v53, %v4413_v41  ;;  %v2541_v19 = vpop.f32.mrb[44].mxu1 }
 0x204   : > { %v2543_v3 = vpop.f32.mrb[45].mxu1 }
 0x205   : > { %v2622_v56 = vadd.f32 %v2606_v32, %v2511_v39  ;;  %v2607_v12 = vmul.f32 %v3220_v51, %v2591_v14  ;;  %v2545_v7 = vpop.f32.mrb[46].mxu1  ;;  %v2593_v39 = vadd.f32 1.0, %v2527_v5  ;;  %v2594_v14 = vadd.f32 1.0, %v2533_v40 }
 0x206   : > { %v2547_v55 = vpop.f32.mrb[47].mxu1 }
 0x207   : > { %v2623_v52 = vadd.f32 %v2607_v12, %v2515_v9  ;;  %v2259_v37 = vpop.f32.mrb[4].mxu0 }
 0x208   : > { %v4493_v33 = vadd.f32 %v2259_v37, %v4418_v44  ;;  %v2261_v0 = vpop.f32.mrb[5].mxu0 }
 0x209   : > { %v3222_v47 = vadd.f32 %v2261_v0, %v4420_v59  ;;  %v2263_v58 = vpop.f32.mrb[6].mxu0  ;;  %v2638_v26 = vpack.c.bf16 %v2623_v52, %v2622_v56 }
 0x20a   : > { %v4497_v11 = vadd.f32 %v2263_v58, %v4425_v50  ;;  %v2265_v41 = vpop.f32.mrb[7].mxu0 }
 0x20b   : > { %v2608_v57 = vmul.f32 %v3222_v47, %v2592_v45  ;;  %v3224_v42 = vadd.f32 %v2265_v41, %v4427_v62  ;;  %3199 = vmatprep.mubr.bf16.mxu1 %v2638_v26  ;;  %v2551_v9 = vpop.f32.mrb[48].mxu1  ;;  %v2596_v26 = vadd.f32 1.0, %v2543_v3 }
 0x20c   : > { %v2553_v8 = vpop.f32.mrb[49].mxu1 }
 0x20d   : > { %v2624_v54 = vadd.f32 %v2608_v57, %v2521_v34  ;;  %v2609_v36 = vmul.f32 %v3224_v42, %v2593_v39  ;;  %v2555_v44 = vpop.f32.mrb[50].mxu1  ;;  %v2595_v34 = vadd.f32 1.0, %v2537_v13 }
 0x20e   : > { %v2557_v59 = vpop.f32.mrb[51].mxu1 }
 0x20f   : > { %v2625_v53 = vadd.f32 %v2609_v36, %v2525_v60  ;;  %v2269_v32 = vpop.f32.mrb[8].mxu0 }
 0x210   : > { %v4501_v51 = vadd.f32 %v2269_v32, %v4438_v48  ;;  %v2271_v50 = vpop.f32.mrb[9].mxu0 }
 0x211   : > { %v2639_v56 = vpack.c.bf16 %v2625_v53, %v2624_v54  ;;  %v3226_v5 = vadd.f32 %v2271_v50, %v4440_v10  ;;  %v2273_v12 = vpop.f32.mrb[10].mxu0 }
 0x212   : > { %v4505_v62 = vadd.f32 %v2273_v12, %v4442_v6  ;;  %v2275_v52 = vpop.f32.mrb[11].mxu0 }
 0x213   : > { %v2610_v45 = vmul.f32 %v3226_v5, %v2594_v14  ;;  %v3228_v37 = vadd.f32 %v2275_v52, %v4444_v17  ;;  %3200 = vmatmul.mubr.bf16.vlgmr.msra.gmra.mrb[64].mxu1 %v2639_v56  ;;  %v2561_v60 = vpop.f32.mrb[52].mxu1  ;;  %v2598_v56 = vadd.f32 1.0, %v2553_v8 }
 0x214   : > { %v2563_v47 = vpop.f32.mrb[53].mxu1 }
 0x215   : > { %v2626_v40 = vadd.f32 %v2610_v45, %v2531_v30  ;;  %v2611_v0 = vmul.f32 %v3228_v37, %v2595_v34  ;;  %v2565_v48 = vpop.f32.mrb[54].mxu1  ;;  %v2597_v30 = vadd.f32 1.0, %v2547_v55 }
 0x216   : > { %v2567_v39 = vpop.f32.mrb[55].mxu1 }
 0x217   : > { %v2627_v58 = vadd.f32 %v2611_v0, %v2535_v27  ;;  %v2279_v41 = vpop.f32.mrb[12].mxu0 }
 0x218   : > { %v4509_v10 = vadd.f32 %v2279_v41, %v4446_v1  ;;  %v2281_v6 = vpop.f32.mrb[13].mxu0  ;;  %v2600_v41 = vadd.f32 1.0, %v2563_v47 }
 0x219   : > { %v3230_v57 = vadd.f32 %v2281_v6, %v4448_v18  ;;  %v2283_v13 = vpop.f32.mrb[14].mxu0  ;;  %v2640_v42 = vpack.c.bf16 %v2627_v58, %v2626_v40 }
 0x21a   : > { %v4513_v17 = vadd.f32 %v2283_v13, %v4450_v21  ;;  %v2285_v54 = vpop.f32.mrb[15].mxu0 }
 0x21b   : > { %v2612_v36 = vmul.f32 %v3230_v57, %v2596_v26  ;;  %v3232_v53 = vadd.f32 %v2285_v54, %v4452_v24  ;;  %3203 = vmatprep.mubr.bf16.mxu1 %v2640_v42  ;;  %v2571_v27 = vpop.f32.mrb[56].mxu1 }
 0x21c   : > { %v2573_v32 = vpop.f32.mrb[57].mxu1 }
 0x21d   : > { %v2628_v3 = vadd.f32 %v2612_v36, %v2541_v19  ;;  %v2613_v14 = vmul.f32 %v3232_v53, %v2597_v30  ;;  %v2575_v1 = vpop.f32.mrb[58].mxu1  ;;  %v2599_v19 = vadd.f32 1.0, %v2557_v59 }
 0x21e   : > { %v2577_v18 = vpop.f32.mrb[59].mxu1 }
 0x21f   : > { %v2629_v50 = vadd.f32 %v2613_v14, %v2545_v7  ;;  %v2289_v5 = vpop.f32.mrb[16].mxu0 }
 0x220   : > { %v4517_v12 = vadd.f32 %v2289_v5, %v4454_v29  ;;  %v2291_v21 = vpop.f32.mrb[17].mxu0 }
 0x221   : > { %v3234_v52 = vadd.f32 %v2291_v21, %v4456_v2  ;;  %v2293_v55 = vpop.f32.mrb[18].mxu0  ;;  %v2641_v34 = vpack.c.bf16 %v2629_v50, %v2628_v3  ;;  %v2602_v3 = vadd.f32 1.0, %v2573_v32  ;;  %v2603_v21 = vadd.f32 1.0, %v2577_v18 }
 0x222   : > { %v4521_v24 = vadd.f32 %v2293_v55, %v4458_v43  ;;  %v2295_v45 = vpop.f32.mrb[19].mxu0 }
 0x223   : > { %v2614_v37 = vmul.f32 %v3234_v52, %v2598_v56  ;;  %v3236_v40 = vadd.f32 %v2295_v45, %v4460_v31  ;;  %3204 = vmatmul.mubr.bf16.gmra.mrb[68].mxu1 %v2641_v34  ;;  %v2581_v7 = vpop.f32.mrb[60].mxu1 }
 0x224   : > { %v2583_v58 = vpop.f32.mrb[61].mxu1 }
 0x225   : > { %v2630_v8 = vadd.f32 %v2614_v37, %v2551_v9  ;;  %v2615_v0 = vmul.f32 %v3236_v40, %v2599_v19  ;;  %v2585_v29 = vpop.f32.mrb[62].mxu1  ;;  %v2601_v9 = vadd.f32 1.0, %v2567_v39  ;;  %v2604_v55 = vadd.f32 1.0, %v2583_v58 }
 0x226   : > { %v2587_v2 = vpop.f32.mrb[63].mxu1 }
 0x227   : > { %v2631_v26 = vadd.f32 %v2615_v0, %v2555_v44  ;;  %v2299_v6 = vpop.f32.mrb[20].mxu0 }
 0x228   : > { %v4525_v57 = vadd.f32 %v2299_v6, %v4462_v4  ;;  %v2301_v43 = vpop.f32.mrb[21].mxu0 }
 0x229   : > { %v3238_v13 = vadd.f32 %v2301_v43, %v4464_v38  ;;  %v2303_v59 = vpop.f32.mrb[22].mxu0  ;;  %v2642_v42 = vpack.c.bf16 %v2631_v26, %v2630_v8 }
 0x22a   : > { %v4529_v31 = vadd.f32 %v2303_v59, %v4466_v35  ;;  %v2305_v54 = vpop.f32.mrb[23].mxu0 }
 0x22b   : > { %v2616_v30 = vmul.f32 %v3238_v13, %v2600_v41  ;;  %v3240_v36 = vadd.f32 %v2305_v54, %v4468_v22  ;;  %3207 = vmatprep.mubr.bf16.mxu1 %v2642_v42 }
 0x22d   : > { %v2632_v44 = vadd.f32 %v2616_v30, %v2561_v60  ;;  %v2617_v47 = vmul.f32 %v3240_v36, %v2601_v9 }
 0x22f   : > { %v2633_v53 = vadd.f32 %v2617_v47, %v2565_v48  ;;  %v2309_v4 = vpop.f32.mrb[24].mxu0 }
 0x230   : > { %v4533_v14 = vadd.f32 %v2309_v4, %v4470_v61  ;;  %v2311_v38 = vpop.f32.mrb[25].mxu0 }
 0x231   : > { %v3242_v50 = vadd.f32 %v2311_v38, %v4472_v23  ;;  %v2313_v56 = vpop.f32.mrb[26].mxu0  ;;  %v2643_v35 = vpack.c.bf16 %v2633_v53, %v2632_v44 }
 0x232   : > { %v4537_v5 = vadd.f32 %v2313_v56, %v4474_v63  ;;  %v2315_v39 = vpop.f32.mrb[27].mxu0 }
 0x233   : > { %v2618_v22 = vmul.f32 %v3242_v50, %v2602_v3  ;;  %v3244_v60 = vadd.f32 %v2315_v39, %v4476_v46  ;;  %3208 = vmatmul.mubr.bf16.gmra.mrb[72].mxu1 %v2643_v35  ;;  %v2605_v46 = vadd.f32 1.0, %v2587_v2 }
 0x235   : > { %v2634_v48 = vadd.f32 %v2618_v22, %v2571_v27  ;;  %v2619_v32 = vmul.f32 %v3244_v60, %v2603_v21 }
 0x237   : > { %v2635_v52 = vadd.f32 %v2619_v32, %v2575_v1  ;;  %v2319_v61 = vpop.f32.mrb[28].mxu0 }
 0x238   : > { %v4541_v34 = vadd.f32 %v2319_v61, %v4478_v25  ;;  %v2321_v23 = vpop.f32.mrb[29].mxu0 }
 0x239   : > { %v3246_v45 = vadd.f32 %v2321_v23, %v4480_v20  ;;  %v2323_v63 = vpop.f32.mrb[30].mxu0  ;;  %v2644_v19 = vpack.c.bf16 %v2635_v52, %v2634_v48  ;;  %v3135_v20 = vld [vmem:[%s4608_s4] ss:$0 sm:$0xff] }
 0x23a   : > { %v4545_v18 = vadd.f32 %v2323_v63, %v4482_v49  ;;  %v2325_v37 = vpop.f32.mrb[31].mxu0  ;;  %v2385_v58 = vadd.f32 %v4493_v33, %v3135_v20  ;;  %v2386_v26 = vadd.f32 %v4497_v11, %v3135_v20  ;;  %v2384_v33 = vadd.f32 %v4489_v28, %v3135_v20 }
 0x23b   : > { %v2620_v40 = vmul.f32 %v3246_v45, %v2604_v55  ;;  %v3248_v27 = vadd.f32 %v2325_v37, %v4484_v15  ;;  %3211 = vmatprep.mubr.bf16.mxu1 %v2644_v19  ;;  %v2383_v15 = vadd.f32 %v4486_v16, %v3135_v20  ;;  %v2389_v16 = vadd.f32 %v4509_v10, %v3135_v20 }
 0x23c   : > { %v2387_v11 = vadd.f32 %v4501_v51, %v3135_v20  ;;  %v2390_v28 = vadd.f32 %v4513_v17, %v3135_v20  ;;  %v2388_v36 = vadd.f32 %v4505_v62, %v3135_v20  ;;  %v2393_v51 = vadd.f32 %v4525_v57, %v3135_v20 }
 0x23d   : > { %v2636_v1 = vadd.f32 %v2620_v40, %v2581_v7  ;;  %v2621_v8 = vmul.f32 %v3248_v27, %v2605_v46  ;;  %v2391_v17 = vadd.f32 %v4517_v12, %v3135_v20  ;;  %v2394_v62 = vadd.f32 %v4529_v31, %v3135_v20 }
 0x23e   : > { %v2392_v56 = vadd.f32 %v4521_v24, %v3135_v20  ;;  %v2397_v12 = vadd.f32 %v4541_v34, %v3135_v20  ;;  %v2395_v31 = vadd.f32 %v4533_v14, %v3135_v20  ;;  %v2398_v24 = vadd.f32 %v4545_v18, %v3135_v20 }
 0x23f   : > { %v2637_v0 = vadd.f32 %v2621_v8, %v2585_v29  ;;  %v2396_v52 = vadd.f32 %v4537_v5, %v3135_v20 }
 0x241   : > { %v2645_v25 = vpack.c.bf16 %v2637_v0, %v2636_v1 }
 0x243   : > { %3212 = vmatmul.mubr.bf16.gmra.mrb[76].mxu1 %v2645_v25 }
 0x2e6   : > { %v3201_v49 = vpop.f32.mrb[64].mxu1 }
 0x2e7   : > { %v2809_v7 = vadd.f32 %v3201_v49, %v2385_v58  ;;  %v2744_v29 = vpop.f32.mrb[65].mxu1 }
 0x2e8   : > { %v2807_v41 = vadd.f32 %v2744_v29, %v2383_v15  ;;  %v3202_v6 = vpop.f32.mrb[66].mxu1 }
 0x2e9   : > { %2825 = vst [vmem:[%s4556_s22 + $0x10] sm:$0xff] %v2809_v7  ;;  %v2810_v2 = vadd.f32 %v3202_v6, %v2386_v26  ;;  %v2747_v43 = vpop.f32.mrb[67].mxu1 }
 0x2ea   : > { %2823 = vst [vmem:[%s4556_s22] sm:$0xff] %v2807_v41  ;;  %v2808_v13 = vadd.f32 %v2747_v43, %v2384_v33 }
 0x2eb   : > { %2826 = vst [vmem:[%s4556_s22 + $0x18] sm:$0xff] %v2810_v2 }
 0x2ec   : > { %2824 = vst [vmem:[%s4556_s22 + $0x8] sm:$0xff] %v2808_v13 }
 0x2f6   : > { %v3205_v59 = vpop.f32.mrb[68].mxu1 }
 0x2f7   : > { %v2813_v42 = vadd.f32 %v3205_v59, %v2389_v16  ;;  %v2760_v54 = vpop.f32.mrb[69].mxu1 }
 0x2f8   : > { %v2811_v9 = vadd.f32 %v2760_v54, %v2387_v11  ;;  %v3206_v30 = vpop.f32.mrb[70].mxu1 }
 0x2f9   : > { %2829 = vst [vmem:[%s4556_s22 + $0x30] sm:$0xff] %v2813_v42  ;;  %v2814_v44 = vadd.f32 %v3206_v30, %v2390_v28  ;;  %v2763_v47 = vpop.f32.mrb[71].mxu1 }
 0x2fa   : > { %2827 = vst [vmem:[%s4556_s22 + $0x20] sm:$0xff] %v2811_v9  ;;  %v2812_v53 = vadd.f32 %v2763_v47, %v2388_v36 }
 0x2fb   : > { %2830 = vst [vmem:[%s4556_s22 + $0x38] sm:$0xff] %v2814_v44 }
 0x2fc   : > { %2828 = vst [vmem:[%s4556_s22 + $0x28] sm:$0xff] %v2812_v53 }
 0x306   : > { %v3209_v10 = vpop.f32.mrb[72].mxu1 }
 0x307   : > { %v2817_v3 = vadd.f32 %v3209_v10, %v2393_v51  ;;  %v2776_v4 = vpop.f32.mrb[73].mxu1 }
 0x308   : > { %v2815_v38 = vadd.f32 %v2776_v4, %v2391_v17  ;;  %v3210_v50 = vpop.f32.mrb[74].mxu1 }
 0x309   : > { %2833 = vst [vmem:[%s4556_s22 + $0x50] sm:$0xff] %v2817_v3  ;;  %v2818_v35 = vadd.f32 %v3210_v50, %v2394_v62  ;;  %v2779_v39 = vpop.f32.mrb[75].mxu1 }
 0x30a   : > { %2831 = vst [vmem:[%s4556_s22 + $0x40] sm:$0xff] %v2815_v38  ;;  %v2816_v21 = vadd.f32 %v2779_v39, %v2392_v56 }
 0x30b   : > { %2834 = vst [vmem:[%s4556_s22 + $0x58] sm:$0xff] %v2818_v35 }
 0x30c   : > { %2832 = vst [vmem:[%s4556_s22 + $0x48] sm:$0xff] %v2816_v21 }
 0x316   : > { %v3213_v57 = vpop.f32.mrb[76].mxu1 }
 0x317   : > { %v2821_v22 = vadd.f32 %v3213_v57, %v2397_v12  ;;  %v2792_v60 = vpop.f32.mrb[77].mxu1 }
 0x318   : > { %v2819_v48 = vadd.f32 %v2792_v60, %v2395_v31  ;;  %v3214_v32 = vpop.f32.mrb[78].mxu1 }
 0x319   : > { %2837 = vst [vmem:[%s4556_s22 + $0x70] sm:$0xff] %v2821_v22  ;;  %v2822_v55 = vadd.f32 %v3214_v32, %v2398_v24  ;;  %v2795_v61 = vpop.f32.mrb[79].mxu1 }
 0x31a   : > { %2835 = vst [vmem:[%s4556_s22 + $0x60] sm:$0xff] %v2819_v48  ;;  %v2820_v23 = vadd.f32 %v2795_v61, %v2396_v52 }
 0x31b   : > { %2838 = vst [vmem:[%s4556_s22 + $0x78] sm:$0xff] %v2822_v55 }
 0x31c   : > { %2836 = vst [vmem:[%s4556_s22 + $0x68] sm:$0xff] %v2820_v23 }
 0x31d PF: > { %s17_s28 = sadd.s32 1, %s3583_s28   ;;  %s4617_s24 = smov %s3575_s26 }
 0x31e   : > { %p14_p9 = scmp.ge.s32.totalorder %s17_s28, 6   ;;  %s4618_s25 = smov %s3579_s27 }
 0x31f   : > { %s4619_s26 = smov %s4622_s29  ;;  %s4620_s27 = smov %s4626_s30 }
 0x320   :  { %16 = sbr.rel (!%p14_p9) target bundleno = 3 (0x3), region = 92 }

</bundles_post_ra>
